<compile_context>
chip_gen: v5e
topology: v5e:2x2
jax: 0.10.0
libtpu: 0.0.40
codegen_flags: <defaults>
</compile_context>

<pallas_src>
import functools

import jax
import jax.numpy as jnp
from jax.experimental import pallas as pl
from jax.experimental.pallas import tpu as pltpu

EPS = 1e-5


def _round_up(x, m):
    return (x + m - 1) // m * m


# --------------------------------------------------------------------------- #
# Shared kernel helpers
# --------------------------------------------------------------------------- #
def _accumulate_stats(vals, sum_ref, ssq_ref, *, i, tile_n, grid_n, n_valid,
                      needs_mask):
    """sum_ref += sum(vals, 0); ssq_ref += sum(vals**2, 0).

    Padded rows (only possible in the last row tile) are masked out with a
    (tile_n, 1) iota select, guarded by pl.when so every other tile runs the
    unmasked path."""
    if needs_mask:
        @pl.when(i == grid_n - 1)
        def _():
            row = jax.lax.broadcasted_iota(jnp.int32, (tile_n, 1), 0) + i * tile_n
            m = jnp.where(row < n_valid, vals, 0.0)
            sum_ref[...] += jnp.sum(m, axis=0, keepdims=True)
            ssq_ref[...] += jnp.sum(m * m, axis=0, keepdims=True)

        @pl.when(i != grid_n - 1)
        def _():
            sum_ref[...] += jnp.sum(vals, axis=0, keepdims=True)
            ssq_ref[...] += jnp.sum(vals * vals, axis=0, keepdims=True)
    else:
        sum_ref[...] += jnp.sum(vals, axis=0, keepdims=True)
        ssq_ref[...] += jnp.sum(vals * vals, axis=0, keepdims=True)


def _bn_scale_shift(sum_v, ssq_v, gamma, beta, inv_n):
    """Fused BatchNorm (training-mode batch stats): x*scale + shift."""
    mean = sum_v * inv_n
    var = jnp.maximum(ssq_v * inv_n - mean * mean, 0.0)   # clamp: cancellation guard
    scale = gamma * jax.lax.rsqrt(var + EPS)
    shift = beta - mean * scale
    return scale, shift


# --------------------------------------------------------------------------- #
# Fused kernel: whole MLP (except BN2 affine) in one pallas_call
# --------------------------------------------------------------------------- #
def _fused_mlp_kernel(x_ref, w1_ref, b1_ref, g1_ref, be1_ref, w2_ref, b2_ref,
                      y_ref, sum2_ref, ssq2_ref,
                      h_vmem, sum1_vmem, ssq1_vmem, *,
                      n_valid, tile_n, grid_n, needs_mask, inv_n):
    p = pl.program_id(0)   # phase: 0 = linear1 + h-stats, 1 = BN1+ReLU+linear2 + y-stats
    i = pl.program_id(1)   # row tile

    @pl.when(jnp.logical_and(p == 0, i == 0))
    def _():
        sum1_vmem[...] = jnp.zeros_like(sum1_vmem)
        ssq1_vmem[...] = jnp.zeros_like(ssq1_vmem)

    @pl.when(p == 0)
    def _phase0():
        h = jnp.dot(x_ref[...].astype(jnp.bfloat16), w1_ref[...],
                    preferred_element_type=jnp.float32) + b1_ref[...]
        if grid_n == 1:
            h_vmem[...] = h
        else:
            h_vmem[pl.ds(i * tile_n, tile_n), :] = h
        _accumulate_stats(h, sum1_vmem, ssq1_vmem, i=i, tile_n=tile_n,
                          grid_n=grid_n, n_valid=n_valid, needs_mask=needs_mask)

    @pl.when(p == 1)
    def _phase1():
        @pl.when(i == 0)
        def _():
            sum2_ref[...] = jnp.zeros_like(sum2_ref)
            ssq2_ref[...] = jnp.zeros_like(ssq2_ref)

        scale1, shift1 = _bn_scale_shift(sum1_vmem[...], ssq1_vmem[...],
                                         g1_ref[...], be1_ref[...], inv_n)
        if grid_n == 1:
            h = h_vmem[...]
        else:
            h = h_vmem[pl.ds(i * tile_n, tile_n), :]
        hn = jnp.maximum(h * scale1 + shift1, 0.0)          # BN1 + ReLU in f32
        y = jnp.dot(hn.astype(jnp.bfloat16), w2_ref[...],
                    preferred_element_type=jnp.float32) + b2_ref[...]
        y_ref[...] = y
        _accumulate_stats(y, sum2_ref, ssq2_ref, i=i, tile_n=tile_n,
                          grid_n=grid_n, n_valid=n_valid, needs_mask=needs_mask)


# --------------------------------------------------------------------------- #
# Fallback kernels: two passes with a bf16 h intermediate through HBM
# --------------------------------------------------------------------------- #
def _linear1_stats_kernel(x_ref, w1_ref, b1_ref, h_ref, sum1_ref, ssq1_ref, *,
                          n_valid, tile_n, grid_n, needs_mask):
    i = pl.program_id(0)

    @pl.when(i == 0)
    def _():
        sum1_ref[...] = jnp.zeros_like(sum1_ref)
        ssq1_ref[...] = jnp.zeros_like(ssq1_ref)

    h = jnp.dot(x_ref[...].astype(jnp.bfloat16), w1_ref[...],
                preferred_element_type=jnp.float32) + b1_ref[...]
    h_ref[...] = h.astype(h_ref.dtype)        # bf16 intermediate (stats stay f32)
    _accumulate_stats(h, sum1_ref, ssq1_ref, i=i, tile_n=tile_n,
                      grid_n=grid_n, n_valid=n_valid, needs_mask=needs_mask)


def _bn_relu_linear2_stats_kernel(h_ref, sum1_ref, ssq1_ref, g1_ref, be1_ref,
                                  w2_ref, b2_ref, y_ref, sum2_ref, ssq2_ref, *,
                                  n_valid, tile_n, grid_n, needs_mask, inv_n):
    i = pl.program_id(0)

    @pl.when(i == 0)
    def _():
        sum2_ref[...] = jnp.zeros_like(sum2_ref)
        ssq2_ref[...] = jnp.zeros_like(ssq2_ref)

    scale1, shift1 = _bn_scale_shift(sum1_ref[...], ssq1_ref[...],
                                     g1_ref[...], be1_ref[...], inv_n)
    hn = jnp.maximum(h_ref[...].astype(jnp.float32) * scale1 + shift1, 0.0)
    y = jnp.dot(hn.astype(jnp.bfloat16), w2_ref[...],
                preferred_element_type=jnp.float32) + b2_ref[...]
    y_ref[...] = y
    _accumulate_stats(y, sum2_ref, ssq2_ref, i=i, tile_n=tile_n,
                      grid_n=grid_n, n_valid=n_valid, needs_mask=needs_mask)


# --------------------------------------------------------------------------- #
# Wrapper
# --------------------------------------------------------------------------- #
def _vmem_limits():
    """Per-generation VMEM budget (v5e/v6e: 128 MiB, v7x: 64 MiB physical)."""
    try:
        cap = int(pltpu.get_tpu_info().vmem_capacity_bytes)
    except Exception:
        cap = 64 * 1024 * 1024                     # conservative (v7x-sized) fallback
    vmem_limit = min((cap * 3) // 4, 96 * 1024 * 1024)   # 96 MiB v5e/v6e, 48 MiB v7x
    h_budget = vmem_limit // 2                             # cap for VMEM-resident h
    return vmem_limit, h_budget


def mlp_forward(x, params, *, tile_n=None, force_two_pass=False):
    """x: (N, input_dim) float32.  params: dict from init_params."""
    n, in_dim = x.shape
    hidden = params["w1"].shape[1]
    out_dim = params["w2"].shape[1]
    f32, bf16 = jnp.float32, jnp.bfloat16

    vmem_limit, h_budget = _vmem_limits()

    # ---- row tiling (no feature-dim padding anywhere) ---------------------- #
    if tile_n is None:
        tile_n = n if n <= 1024 else 1024
        row_bytes = 2 * 4 * (in_dim + hidden + out_dim)   # rough dbl-buffered bytes/row
        while tile_n > 128 and tile_n * row_bytes > vmem_limit // 2:
            tile_n //= 2
    tile_n = max(1, int(tile_n))
    if tile_n >= n:
        tile_n = n                              # single full-batch tile: no pad, no mask
    else:
        tile_n = min(_round_up(tile_n, 16), n)  # sublane-aligned for f32 and bf16 tiles
    n_p = _round_up(n, tile_n)
    grid_n = n_p // tile_n
    needs_mask = n_p != n
    inv_n = 1.0 / n

    # Zero row-pad only when the last tile is ragged (lane dim stays un-padded, f32).
    x_in = x.astype(f32)
    if needs_mask:
        x_in = jnp.pad(x_in, ((0, n_p - n), (0, 0)))

    # Weights pre-cast to bf16 for the MXU; bias/BN params stay f32.
    w1 = params["w1"].astype(bf16)
    w2 = params["w2"].astype(bf16)
    b1 = params["b1"].reshape(1, -1).astype(f32)
    g1 = params["gamma1"].reshape(1, -1).astype(f32)
    be1 = params["beta1"].reshape(1, -1).astype(f32)
    b2 = params["b2"].reshape(1, -1).astype(f32)

    h_scratch_bytes = n_p * hidden * 4
    use_fused = (not force_two_pass) and (h_scratch_bytes <= h_budget)

    if use_fused:
        # ---- single fused pallas_call: h never touches HBM ---------------- #
        const = lambda r, c: pl.BlockSpec((r, c), lambda p, i: (0, 0))
        y, s2, ss2 = pl.pallas_call(
            functools.partial(_fused_mlp_kernel, n_valid=n, tile_n=tile_n,
                              grid_n=grid_n, needs_mask=needs_mask, inv_n=inv_n),
            grid=(2, grid_n),
            in_specs=[
                # x: row-tiled in phase 0; pinned to block 0 in phase 1 (not read there)
                pl.BlockSpec((tile_n, in_dim), lambda p, i: (i * (1 - p), 0)),
                const(in_dim, hidden),    # w1 (bf16)
                const(1, hidden),         # b1
                const(1, hidden),         # gamma1
                const(1, hidden),         # beta1
                const(hidden, out_dim),   # w2 (bf16)
                const(1, out_dim),        # b2
            ],
            out_specs=[
                # y: written in phase 1 only; pinned to block 0 during phase 0
                pl.BlockSpec((tile_n, out_dim), lambda p, i: (i * p, 0)),
                const(1, out_dim),        # sum(y)
                const(1, out_dim),        # sum(y*y)
            ],
            out_shape=[jax.ShapeDtypeStruct((n_p, out_dim), f32),
                       jax.ShapeDtypeStruct((1, out_dim), f32),
                       jax.ShapeDtypeStruct((1, out_dim), f32)],
            scratch_shapes=[pltpu.VMEM((n_p, hidden), f32),   # resident h
                            pltpu.VMEM((1, hidden), f32),     # sum(h)
                            pltpu.VMEM((1, hidden), f32)],    # sum(h*h)
            compiler_params=pltpu.CompilerParams(
                dimension_semantics=("arbitrary", "arbitrary"),
                vmem_limit_bytes=vmem_limit),
        )(x_in, w1, b1, g1, be1, w2, b2)
    else:
        # ---- fallback: two passes, bf16 h intermediate through HBM -------- #
        const1 = lambda r, c: pl.BlockSpec((r, c), lambda i: (0, 0))
        row1 = lambda c: pl.BlockSpec((tile_n, c), lambda i: (i, 0))
        cp = pltpu.CompilerParams(dimension_semantics=("arbitrary",),
                                  vmem_limit_bytes=vmem_limit)

        h, s1, ss1 = pl.pallas_call(
            functools.partial(_linear1_stats_kernel, n_valid=n, tile_n=tile_n,
                              grid_n=grid_n, needs_mask=needs_mask),
            grid=(grid_n,),
            in_specs=[row1(in_dim), const1(in_dim, hidden), const1(1, hidden)],
            out_specs=[row1(hidden), const1(1, hidden), const1(1, hidden)],
            out_shape=[jax.ShapeDtypeStruct((n_p, hidden), bf16),
                       jax.ShapeDtypeStruct((1, hidden), f32),
                       jax.ShapeDtypeStruct((1, hidden), f32)],
            compiler_params=cp,
        )(x_in, w1, b1)

        y, s2, ss2 = pl.pallas_call(
            functools.partial(_bn_relu_linear2_stats_kernel, n_valid=n,
                              tile_n=tile_n, grid_n=grid_n,
                              needs_mask=needs_mask, inv_n=inv_n),
            grid=(grid_n,),
            in_specs=[row1(hidden), const1(1, hidden), const1(1, hidden),
                      const1(1, hidden), const1(1, hidden),
                      const1(hidden, out_dim), const1(1, out_dim)],
            out_specs=[row1(out_dim), const1(1, out_dim), const1(1, out_dim)],
            out_shape=[jax.ShapeDtypeStruct((n_p, out_dim), f32),
                       jax.ShapeDtypeStruct((1, out_dim), f32),
                       jax.ShapeDtypeStruct((1, out_dim), f32)],
            compiler_params=cp,
        )(h, s1, ss1, g1, be1, w2, b2)

    # ---- BN2 (+ row slice): tiny per-feature affine, left to fused XLA ----- #
    scale2, shift2 = _bn_scale_shift(
        s2, ss2, params["gamma2"].reshape(1, -1).astype(f32),
        params["beta2"].reshape(1, -1).astype(f32), inv_n)
    return y[:n] * scale2 + shift2


# --------------------------------------------------------------------------- #
# Params & reference
# --------------------------------------------------------------------------- #
def init_params(key, input_dim, hidden_dim, output_dim):
    """Weights stored in (in, out) layout (transpose of torch Linear.weight)."""
    k1, k2, k3, k4 = jax.random.split(key, 4)
    lim1 = 1.0 / jnp.sqrt(input_dim)
    lim2 = 1.0 / jnp.sqrt(hidden_dim)
    return {
        "w1": jax.random.uniform(k1, (input_dim, hidden_dim), jnp.float32, -lim1, lim1),
        "b1": jax.random.uniform(k2, (hidden_dim,), jnp.float32, -lim1, lim1),
        "gamma1": jnp.ones((hidden_dim,), jnp.float32),
        "beta1": jnp.zeros((hidden_dim,), jnp.float32),
        "w2": jax.random.uniform(k3, (hidden_dim, output_dim), jnp.float32, -lim2, lim2),
        "b2": jax.random.uniform(k4, (output_dim,), jnp.float32, -lim2, lim2),
        "gamma2": jnp.ones((output_dim,), jnp.float32),
        "beta2": jnp.zeros((output_dim,), jnp.float32),
    }


def mlp_reference(x, params, *, bf16_h=False):
    """Pure-JAX reference mirroring the kernel math (bf16 MXU dots, f32 BN).

    bf16_h=True mirrors the two-pass fallback, where h round-trips HBM in bf16
    (the BN1 statistics are still computed from the f32 h, as in the kernel)."""
    bf16 = jnp.bfloat16
    h = jnp.dot(x.astype(bf16), params["w1"].astype(bf16),
                preferred_element_type=jnp.float32) + params["b1"]
    m = h.mean(0)
    v = ((h - m) ** 2).mean(0)
    if bf16_h:
        h = h.astype(bf16).astype(jnp.float32)
    h = jnp.maximum((h - m) * jax.lax.rsqrt(v + EPS) * params["gamma1"]
                    + params["beta1"], 0.0)
    y = jnp.dot(h.astype(bf16), params["w2"].astype(bf16),
                preferred_element_type=jnp.float32) + params["b2"]
    m = y.mean(0)
    v = ((y - m) ** 2).mean(0)
    return (y - m) * jax.lax.rsqrt(v + EPS) * params["gamma2"] + params["beta2"]


if __name__ == "__main__":
    N, INPUT_DIM, HIDDEN_DIM, OUTPUT_DIM = 200, 16, 32, 8

    key = jax.random.PRNGKey(0)
    kx, kp = jax.random.split(key)
    x = jax.random.normal(kx, (N, INPUT_DIM), jnp.float32)
    params = init_params(kp, INPUT_DIM, HIDDEN_DIM, OUTPUT_DIM)

    ref = mlp_reference(x, params)

    # (a) default: fused single pallas_call, whole batch in one tile, h in VMEM.
    out = jax.block_until_ready(mlp_forward(x, params))
    assert out.shape == (N, OUTPUT_DIM)
    err = float(jnp.max(jnp.abs(out - ref)))
    assert jnp.allclose(out, ref, atol=5e-3, rtol=5e-3), \
        f"fused single-tile mismatch (max abs err {err})"

    # (b) fused path, multi-tile grid with a masked ragged last row tile.
    out_b = jax.block_until_ready(mlp_forward(x, params, tile_n=64))
    err_b = float(jnp.max(jnp.abs(out_b - ref)))
    assert jnp.allclose(out_b, ref, atol=5e-3, rtol=5e-3), \
        f"fused multi-tile mismatch (max abs err {err_b})"

    # (c) two-pass fallback (bf16 h intermediate through HBM), multi-tile.
    ref_c = mlp_reference(x, params, bf16_h=True)
    out_c = jax.block_until_ready(
        mlp_forward(x, params, tile_n=64, force_two_pass=True))
    err_c = float(jnp.max(jnp.abs(out_c - ref_c)))
    assert jnp.allclose(out_c, ref_c, atol=1e-2, rtol=1e-2), \
        f"two-pass fallback mismatch (max abs err {err_c})"

    print("KERNEL_OK")
</pallas_src>

<mosaic_0001>
module attributes {stable_mosaic.version = 11 : i64} {
  func.func @_fused_mlp_kernel(%arg0: i32, %arg1: i32, %arg2: memref<200x16xf32, #tpu.memory_space<vmem>>, %arg3: memref<16x32xbf16, #tpu.memory_space<vmem>>, %arg4: memref<1x32xf32, #tpu.memory_space<vmem>>, %arg5: memref<1x32xf32, #tpu.memory_space<vmem>>, %arg6: memref<1x32xf32, #tpu.memory_space<vmem>>, %arg7: memref<32x8xbf16, #tpu.memory_space<vmem>>, %arg8: memref<1x8xf32, #tpu.memory_space<vmem>>, %arg9: memref<200x8xf32, #tpu.memory_space<vmem>>, %arg10: memref<1x8xf32, #tpu.memory_space<vmem>>, %arg11: memref<1x8xf32, #tpu.memory_space<vmem>>, %arg12: memref<200x32xf32, #tpu.memory_space<vmem>>, %arg13: memref<1x32xf32, #tpu.memory_space<vmem>>, %arg14: memref<1x32xf32, #tpu.memory_space<vmem>>) attributes {dimension_semantics = [#tpu.dimension_semantics<arbitrary>, #tpu.dimension_semantics<arbitrary>], iteration_bounds = array<i64: 2, 1>, scalar_prefetch = 0 : i64, scratch_operands = 3 : i64, tpu.core_type = #tpu.core_type<tc>, window_params = [{transform_indices = @transform_0, window_bounds = array<i64: 200, 16>}, {pipeline_mode = #tpu.pipeline_mode<synchronous>, transform_indices = @transform_1, window_bounds = array<i64: 16, 32>}, {pipeline_mode = #tpu.pipeline_mode<synchronous>, transform_indices = @transform_2, window_bounds = array<i64: 1, 32>}, {pipeline_mode = #tpu.pipeline_mode<synchronous>, transform_indices = @transform_3, window_bounds = array<i64: 1, 32>}, {pipeline_mode = #tpu.pipeline_mode<synchronous>, transform_indices = @transform_4, window_bounds = array<i64: 1, 32>}, {pipeline_mode = #tpu.pipeline_mode<synchronous>, transform_indices = @transform_5, window_bounds = array<i64: 32, 8>}, {pipeline_mode = #tpu.pipeline_mode<synchronous>, transform_indices = @transform_6, window_bounds = array<i64: 1, 8>}, {transform_indices = @transform_7, window_bounds = array<i64: 200, 8>}, {pipeline_mode = #tpu.pipeline_mode<synchronous>, transform_indices = @transform_8, window_bounds = array<i64: 1, 8>}, {pipeline_mode = #tpu.pipeline_mode<synchronous>, transform_indices = @transform_9, window_bounds = array<i64: 1, 8>}]} {
    %c0_i32 = arith.constant 0 : i32
    %0 = arith.cmpi eq, %arg0, %c0_i32 : i32
    %c0_i32_0 = arith.constant 0 : i32
    %1 = arith.cmpi eq, %arg1, %c0_i32_0 : i32
    %2 = arith.andi %0, %1 : i1
    %3 = arith.extui %2 : i1 to i32
    %c0_i32_1 = arith.constant 0 : i32
    %4 = arith.cmpi ne, %3, %c0_i32_1 : i32
    scf.if %4 {
      %cst = arith.constant 0.000000e+00 : f32
      %11 = vector.broadcast %cst : f32 to vector<1x32xf32>
      %c0 = arith.constant 0 : index
      %c0_5 = arith.constant 0 : index
      %12 = vector.load %arg13[%c0, %c0_5] : memref<1x32xf32, #tpu.memory_space<vmem>>, vector<1x32xf32>
      tpu.vector_store %arg13[%c0, %c0_5], %11 {strides = array<i32>} : memref<1x32xf32, #tpu.memory_space<vmem>>, vector<1x32xf32>,
      %cst_6 = arith.constant 0.000000e+00 : f32
      %13 = vector.broadcast %cst_6 : f32 to vector<1x32xf32>
      %c0_7 = arith.constant 0 : index
      %c0_8 = arith.constant 0 : index
      %14 = vector.load %arg14[%c0_7, %c0_8] : memref<1x32xf32, #tpu.memory_space<vmem>>, vector<1x32xf32>
      tpu.vector_store %arg14[%c0_7, %c0_8], %13 {strides = array<i32>} : memref<1x32xf32, #tpu.memory_space<vmem>>, vector<1x32xf32>,
    } else {
    }
    %c0_i32_2 = arith.constant 0 : i32
    %5 = arith.cmpi eq, %arg0, %c0_i32_2 : i32
    %6 = arith.extui %5 : i1 to i32
    %c0_i32_3 = arith.constant 0 : i32
    %7 = arith.cmpi ne, %6, %c0_i32_3 : i32
    scf.if %7 {
      %c0 = arith.constant 0 : index
      %c0_5 = arith.constant 0 : index
      %11 = vector.load %arg2[%c0, %c0_5] : memref<200x16xf32, #tpu.memory_space<vmem>>, vector<200x16xf32>
      %12 = arith.truncf %11 : vector<200x16xf32> to vector<200x16xbf16>
      %c0_6 = arith.constant 0 : index
      %c0_7 = arith.constant 0 : index
      %13 = vector.load %arg3[%c0_6, %c0_7] : memref<16x32xbf16, #tpu.memory_space<vmem>>, vector<16x32xbf16>
      %cst = arith.constant dense<0.000000e+00> : vector<200x32xf32>
      %14 = tpu.matmul %12, %13, %cst {dimension_numbers = #tpu.dot_dimension_numbers<[1], [0], [0], [1], [0, 0, 1, 1], [], []>} : vector<200x16xbf16>, vector<16x32xbf16>, vector<200x32xf32> -> vector<200x32xf32>
      %c0_8 = arith.constant 0 : index
      %c0_9 = arith.constant 0 : index
      %15 = vector.load %arg4[%c0_8, %c0_9] : memref<1x32xf32, #tpu.memory_space<vmem>>, vector<1x32xf32>
      %16 = vector.broadcast %15 : vector<1x32xf32> to vector<200x32xf32>
      %17 = arith.addf %14, %16 : vector<200x32xf32>
      %c0_10 = arith.constant 0 : index
      %c0_11 = arith.constant 0 : index
      %18 = vector.load %arg12[%c0_10, %c0_11] : memref<200x32xf32, #tpu.memory_space<vmem>>, vector<200x32xf32>
      tpu.vector_store %arg12[%c0_10, %c0_11], %17 {strides = array<i32>} : memref<200x32xf32, #tpu.memory_space<vmem>>, vector<200x32xf32>,
      %c0_12 = arith.constant 0 : index
      %c0_13 = arith.constant 0 : index
      %19 = vector.load %arg13[%c0_12, %c0_13] : memref<1x32xf32, #tpu.memory_space<vmem>>, vector<1x32xf32>
      %cst_14 = arith.constant dense<0.000000e+00> : vector<32xf32>
      %20 = vector.multi_reduction <add>, %17, %cst_14 [0] : vector<200x32xf32> to vector<32xf32>
      %21 = vector.shape_cast %20 : vector<32xf32> to vector<1x32xf32>
      %22 = arith.addf %19, %21 : vector<1x32xf32>
      %c0_15 = arith.constant 0 : index
      %c0_16 = arith.constant 0 : index
      %23 = vector.load %arg13[%c0_15, %c0_16] : memref<1x32xf32, #tpu.memory_space<vmem>>, vector<1x32xf32>
      tpu.vector_store %arg13[%c0_15, %c0_16], %22 {strides = array<i32>} : memref<1x32xf32, #tpu.memory_space<vmem>>, vector<1x32xf32>,
      %c0_17 = arith.constant 0 : index
      %c0_18 = arith.constant 0 : index
      %24 = vector.load %arg14[%c0_17, %c0_18] : memref<1x32xf32, #tpu.memory_space<vmem>>, vector<1x32xf32>
      %25 = arith.mulf %17, %17 : vector<200x32xf32>
      %cst_19 = arith.constant dense<0.000000e+00> : vector<32xf32>
      %26 = vector.multi_reduction <add>, %25, %cst_19 [0] : vector<200x32xf32> to vector<32xf32>
      %27 = vector.shape_cast %26 : vector<32xf32> to vector<1x32xf32>
      %28 = arith.addf %24, %27 : vector<1x32xf32>
      %c0_20 = arith.constant 0 : index
      %c0_21 = arith.constant 0 : index
      %29 = vector.load %arg14[%c0_20, %c0_21] : memref<1x32xf32, #tpu.memory_space<vmem>>, vector<1x32xf32>
      tpu.vector_store %arg14[%c0_20, %c0_21], %28 {strides = array<i32>} : memref<1x32xf32, #tpu.memory_space<vmem>>, vector<1x32xf32>,
    } else {
    }
    %c1_i32 = arith.constant 1 : i32
    %8 = arith.cmpi eq, %arg0, %c1_i32 : i32
    %9 = arith.extui %8 : i1 to i32
    %c0_i32_4 = arith.constant 0 : i32
    %10 = arith.cmpi ne, %9, %c0_i32_4 : i32
    scf.if %10 {
      %c0_i32_5 = arith.constant 0 : i32
      %11 = arith.cmpi eq, %arg1, %c0_i32_5 : i32
      %12 = arith.extui %11 : i1 to i32
      %c0_i32_6 = arith.constant 0 : i32
      %13 = arith.cmpi ne, %12, %c0_i32_6 : i32
      scf.if %13 {
        %cst_37 = arith.constant 0.000000e+00 : f32
        %57 = vector.broadcast %cst_37 : f32 to vector<1x8xf32>
        %c0_38 = arith.constant 0 : index
        %c0_39 = arith.constant 0 : index
        %58 = vector.load %arg10[%c0_38, %c0_39] : memref<1x8xf32, #tpu.memory_space<vmem>>, vector<1x8xf32>
        tpu.vector_store %arg10[%c0_38, %c0_39], %57 {strides = array<i32>} : memref<1x8xf32, #tpu.memory_space<vmem>>, vector<1x8xf32>,
        %cst_40 = arith.constant 0.000000e+00 : f32
        %59 = vector.broadcast %cst_40 : f32 to vector<1x8xf32>
        %c0_41 = arith.constant 0 : index
        %c0_42 = arith.constant 0 : index
        %60 = vector.load %arg11[%c0_41, %c0_42] : memref<1x8xf32, #tpu.memory_space<vmem>>, vector<1x8xf32>
        tpu.vector_store %arg11[%c0_41, %c0_42], %59 {strides = array<i32>} : memref<1x8xf32, #tpu.memory_space<vmem>>, vector<1x8xf32>,
      } else {
      }
      %c0 = arith.constant 0 : index
      %c0_7 = arith.constant 0 : index
      %14 = vector.load %arg13[%c0, %c0_7] : memref<1x32xf32, #tpu.memory_space<vmem>>, vector<1x32xf32>
      %c0_8 = arith.constant 0 : index
      %c0_9 = arith.constant 0 : index
      %15 = vector.load %arg14[%c0_8, %c0_9] : memref<1x32xf32, #tpu.memory_space<vmem>>, vector<1x32xf32>
      %c0_10 = arith.constant 0 : index
      %c0_11 = arith.constant 0 : index
      %16 = vector.load %arg5[%c0_10, %c0_11] : memref<1x32xf32, #tpu.memory_space<vmem>>, vector<1x32xf32>
      %c0_12 = arith.constant 0 : index
      %c0_13 = arith.constant 0 : index
      %17 = vector.load %arg6[%c0_12, %c0_13] : memref<1x32xf32, #tpu.memory_space<vmem>>, vector<1x32xf32>
      %cst = arith.constant 5.000000e-03 : f32
      %18 = vector.broadcast %cst : f32 to vector<1x32xf32>
      %19 = arith.mulf %14, %18 : vector<1x32xf32>
      %cst_14 = arith.constant 5.000000e-03 : f32
      %20 = vector.broadcast %cst_14 : f32 to vector<1x32xf32>
      %21 = arith.mulf %15, %20 : vector<1x32xf32>
      %22 = arith.mulf %19, %19 : vector<1x32xf32>
      %23 = arith.subf %21, %22 : vector<1x32xf32>
      %cst_15 = arith.constant 0.000000e+00 : f32
      %24 = vector.broadcast %cst_15 : f32 to vector<1x32xf32>
      %25 = arith.maximumf %23, %24 : vector<1x32xf32>
      %cst_16 = arith.constant 9.99999974E-6 : f32
      %26 = vector.broadcast %cst_16 : f32 to vector<1x32xf32>
      %27 = arith.addf %25, %26 : vector<1x32xf32>
      %28 = math.rsqrt %27 : vector<1x32xf32>
      %29 = arith.mulf %16, %28 : vector<1x32xf32>
      %30 = arith.mulf %19, %29 : vector<1x32xf32>
      %31 = arith.subf %17, %30 : vector<1x32xf32>
      %c0_17 = arith.constant 0 : index
      %c0_18 = arith.constant 0 : index
      %32 = vector.load %arg12[%c0_17, %c0_18] : memref<200x32xf32, #tpu.memory_space<vmem>>, vector<200x32xf32>
      %33 = vector.broadcast %29 : vector<1x32xf32> to vector<200x32xf32>
      %34 = arith.mulf %32, %33 : vector<200x32xf32>
      %35 = vector.broadcast %31 : vector<1x32xf32> to vector<200x32xf32>
      %36 = arith.addf %34, %35 : vector<200x32xf32>
      %cst_19 = arith.constant 0.000000e+00 : f32
      %37 = vector.broadcast %cst_19 : f32 to vector<200x32xf32>
      %38 = arith.maximumf %36, %37 : vector<200x32xf32>
      %39 = arith.truncf %38 : vector<200x32xf32> to vector<200x32xbf16>
      %c0_20 = arith.constant 0 : index
      %c0_21 = arith.constant 0 : index
      %40 = vector.load %arg7[%c0_20, %c0_21] : memref<32x8xbf16, #tpu.memory_space<vmem>>, vector<32x8xbf16>
      %cst_22 = arith.constant dense<0.000000e+00> : vector<200x8xf32>
      %41 = tpu.matmul %39, %40, %cst_22 {dimension_numbers = #tpu.dot_dimension_numbers<[1], [0], [0], [1], [0, 0, 1, 1], [], []>} : vector<200x32xbf16>, vector<32x8xbf16>, vector<200x8xf32> -> vector<200x8xf32>
      %c0_23 = arith.constant 0 : index
      %c0_24 = arith.constant 0 : index
      %42 = vector.load %arg8[%c0_23, %c0_24] : memref<1x8xf32, #tpu.memory_space<vmem>>, vector<1x8xf32>
      %43 = vector.broadcast %42 : vector<1x8xf32> to vector<200x8xf32>
      %44 = arith.addf %41, %43 : vector<200x8xf32>
      %c0_25 = arith.constant 0 : index
      %c0_26 = arith.constant 0 : index
      %45 = vector.load %arg9[%c0_25, %c0_26] : memref<200x8xf32, #tpu.memory_space<vmem>>, vector<200x8xf32>
      tpu.vector_store %arg9[%c0_25, %c0_26], %44 {strides = array<i32>} : memref<200x8xf32, #tpu.memory_space<vmem>>, vector<200x8xf32>,
      %c0_27 = arith.constant 0 : index
      %c0_28 = arith.constant 0 : index
      %46 = vector.load %arg10[%c0_27, %c0_28] : memref<1x8xf32, #tpu.memory_space<vmem>>, vector<1x8xf32>
      %cst_29 = arith.constant dense<0.000000e+00> : vector<8xf32>
      %47 = vector.multi_reduction <add>, %44, %cst_29 [0] : vector<200x8xf32> to vector<8xf32>
      %48 = vector.shape_cast %47 : vector<8xf32> to vector<1x8xf32>
      %49 = arith.addf %46, %48 : vector<1x8xf32>
      %c0_30 = arith.constant 0 : index
      %c0_31 = arith.constant 0 : index
      %50 = vector.load %arg10[%c0_30, %c0_31] : memref<1x8xf32, #tpu.memory_space<vmem>>, vector<1x8xf32>
      tpu.vector_store %arg10[%c0_30, %c0_31], %49 {strides = array<i32>} : memref<1x8xf32, #tpu.memory_space<vmem>>, vector<1x8xf32>,
      %c0_32 = arith.constant 0 : index
      %c0_33 = arith.constant 0 : index
      %51 = vector.load %arg11[%c0_32, %c0_33] : memref<1x8xf32, #tpu.memory_space<vmem>>, vector<1x8xf32>
      %52 = arith.mulf %44, %44 : vector<200x8xf32>
      %cst_34 = arith.constant dense<0.000000e+00> : vector<8xf32>
      %53 = vector.multi_reduction <add>, %52, %cst_34 [0] : vector<200x8xf32> to vector<8xf32>
      %54 = vector.shape_cast %53 : vector<8xf32> to vector<1x8xf32>
      %55 = arith.addf %51, %54 : vector<1x8xf32>
      %c0_35 = arith.constant 0 : index
      %c0_36 = arith.constant 0 : index
      %56 = vector.load %arg11[%c0_35, %c0_36] : memref<1x8xf32, #tpu.memory_space<vmem>>, vector<1x8xf32>
      tpu.vector_store %arg11[%c0_35, %c0_36], %55 {strides = array<i32>} : memref<1x8xf32, #tpu.memory_space<vmem>>, vector<1x8xf32>,
    } else {
    }
    return
  }
  func.func @transform_0(%arg0: i32, %arg1: i32) -> (i32, i32) {
    %c1_i32 = arith.constant 1 : i32
    %0 = arith.subi %c1_i32, %arg0 : i32
    %1 = arith.muli %arg1, %0 : i32
    %c0_i32 = arith.constant 0 : i32
    %c0_i32_0 = arith.constant 0 : i32
    return %1, %c0_i32 : i32, i32
  }
  func.func @transform_1(%arg0: i32, %arg1: i32) -> (i32, i32) {
    %c0_i32 = arith.constant 0 : i32
    %c0_i32_0 = arith.constant 0 : i32
    %c0_i32_1 = arith.constant 0 : i32
    return %c0_i32, %c0_i32_0 : i32, i32
  }
  func.func @transform_2(%arg0: i32, %arg1: i32) -> (i32, i32) {
    %c0_i32 = arith.constant 0 : i32
    %c0_i32_0 = arith.constant 0 : i32
    %c0_i32_1 = arith.constant 0 : i32
    return %c0_i32, %c0_i32_0 : i32, i32
  }
  func.func @transform_3(%arg0: i32, %arg1: i32) -> (i32, i32) {
    %c0_i32 = arith.constant 0 : i32
    %c0_i32_0 = arith.constant 0 : i32
    %c0_i32_1 = arith.constant 0 : i32
    return %c0_i32, %c0_i32_0 : i32, i32
  }
  func.func @transform_4(%arg0: i32, %arg1: i32) -> (i32, i32) {
    %c0_i32 = arith.constant 0 : i32
    %c0_i32_0 = arith.constant 0 : i32
    %c0_i32_1 = arith.constant 0 : i32
    return %c0_i32, %c0_i32_0 : i32, i32
  }
  func.func @transform_5(%arg0: i32, %arg1: i32) -> (i32, i32) {
    %c0_i32 = arith.constant 0 : i32
    %c0_i32_0 = arith.constant 0 : i32
    %c0_i32_1 = arith.constant 0 : i32
    return %c0_i32, %c0_i32_0 : i32, i32
  }
  func.func @transform_6(%arg0: i32, %arg1: i32) -> (i32, i32) {
    %c0_i32 = arith.constant 0 : i32
    %c0_i32_0 = arith.constant 0 : i32
    %c0_i32_1 = arith.constant 0 : i32
    return %c0_i32, %c0_i32_0 : i32, i32
  }
  func.func @transform_7(%arg0: i32, %arg1: i32) -> (i32, i32) {
    %0 = arith.muli %arg1, %arg0 : i32
    %c0_i32 = arith.constant 0 : i32
    %c0_i32_0 = arith.constant 0 : i32
    return %0, %c0_i32 : i32, i32
  }
  func.func @transform_8(%arg0: i32, %arg1: i32) -> (i32, i32) {
    %c0_i32 = arith.constant 0 : i32
    %c0_i32_0 = arith.constant 0 : i32
    %c0_i32_1 = arith.constant 0 : i32
    return %c0_i32, %c0_i32_0 : i32, i32
  }
  func.func @transform_9(%arg0: i32, %arg1: i32) -> (i32, i32) {
    %c0_i32 = arith.constant 0 : i32
    %c0_i32_0 = arith.constant 0 : i32
    %c0_i32_1 = arith.constant 0 : i32
    return %c0_i32, %c0_i32_0 : i32, i32
  }
}

</mosaic_0001>

<bundles_post_ra>
// kernel: tpu_custom_call.1
= control target key start
LH: loop header
LB: loop body
LE: loop exit
PB: predicated region body
PF: predicated region fallthrough
CT: control target
= control target key end

     0   :  { %15 = vsyncpa [#allocation6], 0  ;;  %s2235_s0 = inlined_call_operand.vmem [shape: f32[200,16], index: 0, kind: input, shape index: {}]   ;;  %s2236_s1 = inlined_call_operand.vmem [shape: bf16[16,32], index: 1, kind: input, shape index: {}]   ;;  %s2237_s2 = inlined_call_operand.vmem [shape: f32[1,32], index: 2, kind: input, shape index: {}]   ;;  %s2238_s3 = inlined_call_operand.vmem [shape: f32[1,32], index: 3, kind: input, shape index: {}]   ;;  %s2239_s4 = inlined_call_operand.vmem [shape: f32[1,32], index: 4, kind: input, shape index: {}]   ;;  %s2240_s5 = inlined_call_operand.vmem [shape: bf16[32,8], index: 5, kind: input, shape index: {}]   ;;  %s2241_s6 = inlined_call_operand.vmem [shape: f32[1,8], index: 6, kind: input, shape index: {}]   ;;  %s2242_s7 = inlined_call_operand.vmem [shape: f32[200,8], index: 7, kind: output, shape index: {0}]   ;;  %s2243_s8 = inlined_call_operand.hbm [shape: f32[1,8], index: 8, kind: output, shape index: {1}]   ;;  %s2244_s9 = inlined_call_operand.hbm [shape: f32[1,8], index: 9, kind: output, shape index: {2}]  }
   0x1   :  { %16 = vsyncpa [#allocation8], 0  ;;  %s1533_s30 = smov 0   ;;  %s1535_s10 = smov 0  }
   0x2   :  { %s1537_s11 = smov 0  }
   0x3 LB: > { %s1279_s12 = sadd.s32 4294967295, %s1477_s11   ;;  %s34_s13 = sadd.s32 1, %s1473_s10  ;;  %s1477_s11 = sphi %s1537_s11, %s22_s11   ;;  %s1473_s10 = sphi %s1535_s10, %s2247_s10   ;;  %s1469_s30 = sphi %s1533_s30, %s2246_s30  }
   0x4   : > { %p36_p0 = scmp.ge.s32.totalorder %s34_s13, 2  ;;  %p1284_p1 = scmp.ge.s32.totalorder %s1477_s11, 1 }
   0x5   : > { %p307_p2 = scmp.lt.s32.totalorder %s1477_s11, 3 }
   0x6   : > { %s2249_s13 = smov (%p36_p0, %s34_s13), 0 }
   0x7   : > { %p308_p3 = pnand %p1284_p1, %p307_p2 }
   0x8   : > { %p365_p4 = scmp.eq.s32.totalorder (!%p308_p3), %s1469_s30, 0 }
   0x9   : > { %311 = sbr.rel (%p308_p3) target bundleno = 555 (0x22b), region = 48 }
   0xe   : > { %370 = sbr.rel (!%p365_p4) target bundleno = 19 (0x13), region = 52  ;;  %vm371_vm0 = vcmask (%p365_p4), 253952   ;;  %v1479_v0 = vmov (%p365_p4), 0.0  }
   0xf   : > { %372 = vst.msk [vmem:[#allocation3] sm:$0x1] (%p365_p4), %vm371_vm0, %v1479_v0 }
  0x10   : > { %373 = vst.msk [vmem:[#allocation4] sm:$0x1] (%p365_p4), %vm371_vm0, %v1479_v0 }
  0x13 PF: > { %p1286_p5 = scmp.ne.s32.totalorder %s1469_s30, 0 }
  0x15   : > { %376 = sbr.rel (%p1286_p5) target bundleno = 268 (0x10c), region = 56 }
  0x1a   : > { %v1335_v1 = vld [vmem:[%s2236_s1] sm:$0xff]  ;;  %v378_v3 = vld [vmem:[%s2235_s0 + $0x8] sm:$0xff]  ;;  %vm427_vm1 = vcmask 130048   ;;  %v395_v8 = vld [vmem:[%s2235_s0 + $0x90] sm:$0xff]  ;;  %vm540_vm2 = vcmask 261120   ;;  %vm623_vm3 = vcmask 253952  }
  0x1b   : > { %v377_v2 = vld [vmem:[%s2235_s0] sm:$0xff]  ;;  %v386_v6 = vld [vmem:[%s2235_s0 + $0x48] sm:$0xff]  ;;  %474 = vmatpush.bf16.msra.mxu0 %v1335_v1  ;;  %1338 = vmatpush.bf16.msra.mxu1 %v1335_v1  ;;  %v396_v9 = vld [vmem:[%s2235_s0 + $0x98] sm:$0xff] }
  0x1c   : > { %v402_v4 = vpack.c.bf16 %v378_v3, %v377_v2  ;;  %v385_v5 = vld [vmem:[%s2235_s0 + $0x40] sm:$0xff]  ;;  %1340 = vmatpush.bf16.msra.mxu3 %v1335_v1  ;;  %1339 = vmatpush.bf16.msra.mxu2 %v1335_v1  ;;  %v411_v10 = vpack.c.bf16 %v396_v9, %v395_v8  ;;  %v379_v11 = vld [vmem:[%s2235_s0 + $0x10] sm:$0xff]  ;;  %v380_v12 = vld [vmem:[%s2235_s0 + $0x18] sm:$0xff] }
  0x1d   : > { %v406_v7 = vpack.c.bf16 %v386_v6, %v385_v5  ;;  %v387_v13 = vld [vmem:[%s2235_s0 + $0x50] sm:$0xff]  ;;  %v388_v14 = vld [vmem:[%s2235_s0 + $0x58] sm:$0xff]  ;;  %v397_v15 = vld [vmem:[%s2235_s0 + $0xa0] sm:$0xff]  ;;  %v403_v17 = vpack.c.bf16 %v380_v12, %v379_v11 }
  0x1e   : > { %1291 = vmatmul.msk.bf16.vlgmr.msra.gmra.mxu0 %vm427_vm1, %v402_v4  ;;  %v398_v16 = vld [vmem:[%s2235_s0 + $0xa8] sm:$0xff]  ;;  %v407_v18 = vpack.c.bf16 %v388_v14, %v387_v13  ;;  %v393_v20 = vld [vmem:[%s2235_s0 + $0x80] sm:$0xff]  ;;  %v399_v27 = vld [vmem:[%s2235_s0 + $0xb0] sm:$0xff] }
  0x1f   : > { %1295 = vmatmul.msk.bf16.vlgmr.msra.gmra.mxu1 %vm427_vm1, %v406_v7  ;;  %1300 = vmatmul.msk.bf16.vlgmr.msra.gmra.mxu3 %vm427_vm1, %v411_v10  ;;  %v412_v19 = vpack.c.bf16 %v398_v16, %v397_v15  ;;  %v394_v21 = vld [vmem:[%s2235_s0 + $0x88] sm:$0xff]  ;;  %v381_v23 = vld [vmem:[%s2235_s0 + $0x20] sm:$0xff]  ;;  %v400_v28 = vld [vmem:[%s2235_s0 + $0xb8] sm:$0xff] }
  0x20   : > { %v410_v22 = vpack.c.bf16 %v394_v21, %v393_v20  ;;  %v382_v24 = vld [vmem:[%s2235_s0 + $0x28] sm:$0xff]  ;;  %v389_v25 = vld [vmem:[%s2235_s0 + $0x60] sm:$0xff]  ;;  %v413_v31 = vpack.c.bf16 %v400_v28, %v399_v27  ;;  %v383_v32 = vld [vmem:[%s2235_s0 + $0x30] sm:$0xff] }
  0x21   : > { %v390_v26 = vld [vmem:[%s2235_s0 + $0x68] sm:$0xff]  ;;  %v404_v29 = vpack.c.bf16 %v382_v24, %v381_v23  ;;  %v384_v33 = vld [vmem:[%s2235_s0 + $0x38] sm:$0xff]  ;;  %v391_v34 = vld [vmem:[%s2235_s0 + $0x70] sm:$0xff] }
  0x22   : > { %1299 = vmatmul.msk.bf16.vlgmr.msra.gmra.mxu2 %vm427_vm1, %v410_v22  ;;  %v408_v30 = vpack.c.bf16 %v390_v26, %v389_v25  ;;  %v392_v35 = vld [vmem:[%s2235_s0 + $0x78] sm:$0xff]  ;;  %v401_v36 = vld [vmem:[%s2235_s0 + $0xc0] sm:$0xff]  ;;  %v405_v37 = vpack.c.bf16 %v384_v33, %v383_v32 }
  0x23   : > { %v409_v38 = vpack.c.bf16 %v392_v35, %v391_v34  ;;  %v414_v39 = vpack.c.bf16 %v401_v36, %v401_v36  ;;  %v1650_v40 = vld [vmem:[%s2237_s2] ss:$0 sm:$0xff] }
  0x2e   : > { %1292 = vmatmul.msk.bf16.gmra.mxu0 %vm427_vm1, %v403_v17 }
  0x2f   : > { %1296 = vmatmul.msk.bf16.gmra.mxu1 %vm427_vm1, %v407_v18  ;;  %1301 = vmatmul.msk.bf16.gmra.mxu3 %vm427_vm1, %v412_v19 }
  0x3e   : > { %1293 = vmatmul.msk.bf16.gmra.mxu0 %vm427_vm1, %v404_v29 }
  0x3f   : > { %1297 = vmatmul.msk.bf16.gmra.mxu1 %vm427_vm1, %v408_v30  ;;  %1302 = vmatmul.msk.bf16.gmra.mxu3 %vm427_vm1, %v413_v31 }
  0x4e   : > { %1294 = vmatmul.msk.bf16.gmra.mxu0 %vm427_vm1, %v405_v37 }
  0x4f   : > { %1298 = vmatmul.msk.bf16.gmra.mxu1 %vm427_vm1, %v409_v38  ;;  %1303 = vmatmul.msk.bf16.gmra.mxu3 %vm427_vm1, %v414_v39 }
  0x9b   : > { %v476_v41 = vpop.f32.mrf.mxu0 }
  0x9c   : > { %v496_v42 = vpop.f32.mrf.mxu1  ;;  %v1653_v43 = vadd.f32 %v1650_v40, %v476_v41 }
  0x9d   : > { %v1656_v44 = vadd.f32 %v1650_v40, %v496_v42 }
  0x9e   : > { %541 = vst.msk [vmem:[#allocation2] sm:$0xff] %vm540_vm2, %v1653_v43  ;;  %v626_v21 = vmul.f32 %v1653_v43, %v1653_v43  ;;  %v567_v25 = vsel %vm540_vm2, %v1653_v43, 0.0 }
  0x9f   : > { %549 = vst.msk [vmem:[#allocation2 + $0x40] sm:$0xff] %vm540_vm2, %v1656_v44 }
  0xa0   : > { %v651_v30 = vsel %vm540_vm2, %v626_v21, 0.0  ;;  %v582_v21 = vsel %vm540_vm2, %v1656_v44, 0.0 }
  0xa2   : > { %v521_v45 = vpop.f32.mrf.mxu3 }
  0xa3   : > { %v478_v46 = vpop.f32.mrf.mxu0  ;;  %v522_v48 = vadd.f32 %v1650_v40, %v521_v45 }
  0xa4   : > { %v498_v47 = vpop.f32.mrf.mxu1  ;;  %v479_v49 = vadd.f32 %v1650_v40, %v478_v46 }
  0xa5   : > { %v1665_v50 = vadd.f32 %v1650_v40, %v498_v47  ;;  %559 = vst.msk [vmem:[#allocation2 + $0x90] sm:$0xff] %vm540_vm2, %v522_v48  ;;  %v1669_v51 = vsel %vm540_vm2, %v522_v48, 0.0  ;;  %v644_v52 = vmul.f32 %v522_v48, %v522_v48  ;;  %v516_v5 = vpop.f32.mrf.mxu2 }
  0xa6   : > { %542 = vst.msk [vmem:[#allocation2 + $0x8] sm:$0xff] %vm540_vm2, %v479_v49  ;;  %v1717_v13 = vadd.f32 %v1650_v40, %v516_v5  ;;  %v627_v20 = vmul.f32 %v479_v49, %v479_v49  ;;  %v568_v24 = vsel %vm540_vm2, %v479_v49, 0.0 }
  0xa7   : > { %550 = vst.msk [vmem:[#allocation2 + $0x48] sm:$0xff] %vm540_vm2, %v1665_v50  ;;  %v1675_v53 = vsel %vm540_vm2, %v644_v52, 0.0  ;;  %v569_v31 = vadd.f32 %v568_v24, %v567_v25 }
  0xa8   : > { %557 = vst.msk [vmem:[#allocation2 + $0x80] sm:$0xff] %vm540_vm2, %v1717_v13  ;;  %v652_v26 = vsel %vm540_vm2, %v627_v20, 0.0 }
  0xa9   : > { %v653_v41 = vadd.f32 %v652_v26, %v651_v30 }
  0xaa   : > { %v523_v54 = vpop.f32.mrf.mxu3 }
  0xab   : > { %v481_v55 = vpop.f32.mrf.mxu0  ;;  %v524_v57 = vadd.f32 %v1650_v40, %v523_v54 }
  0xac   : > { %v501_v56 = vpop.f32.mrf.mxu1  ;;  %v482_v58 = vadd.f32 %v1650_v40, %v481_v55 }
  0xad   : > { %v1680_v59 = vadd.f32 %v1650_v40, %v501_v56  ;;  %560 = vst.msk [vmem:[#allocation2 + $0x98] sm:$0xff] %vm540_vm2, %v524_v57  ;;  %v1684_v60 = vsel %vm540_vm2, %v524_v57, 0.0  ;;  %v645_v61 = vmul.f32 %v524_v57, %v524_v57  ;;  %v518_v12 = vpop.f32.mrf.mxu2 }
  0xae   : > { %543 = vst.msk [vmem:[#allocation2 + $0x10] sm:$0xff] %vm540_vm2, %v482_v58  ;;  %v1720_v14 = vadd.f32 %v1650_v40, %v518_v12  ;;  %v628_v22 = vmul.f32 %v482_v58, %v482_v58  ;;  %v570_v27 = vsel %vm540_vm2, %v482_v58, 0.0  ;;  %v634_v12 = vmul.f32 %v1656_v44, %v1656_v44 }
  0xaf   : > { %551 = vst.msk [vmem:[#allocation2 + $0x50] sm:$0xff] %vm540_vm2, %v1680_v59  ;;  %v1690_v62 = vsel %vm540_vm2, %v645_v61, 0.0  ;;  %v571_v42 = vadd.f32 %v570_v27, %v569_v31 }
  0xb0   : > { %558 = vst.msk [vmem:[#allocation2 + $0x88] sm:$0xff] %vm540_vm2, %v1720_v14  ;;  %v654_v32 = vsel %vm540_vm2, %v628_v22, 0.0  ;;  %v635_v22 = vmul.f32 %v1665_v50, %v1665_v50  ;;  %v666_v27 = vsel %vm540_vm2, %v634_v12, 0.0  ;;  %v600_v12 = vsel %vm540_vm2, %v1720_v14, 0.0 }
  0xb1   : > { %v655_v47 = vadd.f32 %v654_v32, %v653_v41  ;;  %v586_v32 = vsel %vm540_vm2, %v1680_v59, 0.0 }
  0xb2   : > { %v526_v63 = vpop.f32.mrf.mxu3  ;;  %v668_v31 = vsel %vm540_vm2, %v635_v22, 0.0 }
  0xb3   : > { %v483_v0 = vpop.f32.mrf.mxu0  ;;  %v1693_v2 = vadd.f32 %v1650_v40, %v526_v63 }
  0xb4   : > { %v503_v1 = vpop.f32.mrf.mxu1  ;;  %v484_v3 = vadd.f32 %v1650_v40, %v483_v0 }
  0xb5   : > { %v1697_v4 = vadd.f32 %v1650_v40, %v503_v1  ;;  %561 = vst.msk [vmem:[#allocation2 + $0xa0] sm:$0xff] %vm540_vm2, %v1693_v2 }
  0xb6   : > { %544 = vst.msk [vmem:[#allocation2 + $0x18] sm:$0xff] %vm540_vm2, %v484_v3  ;;  %v629_v28 = vmul.f32 %v484_v3, %v484_v3  ;;  %v572_v36 = vsel %vm540_vm2, %v484_v3, 0.0 }
  0xb7   : > { %552 = vst.msk [vmem:[#allocation2 + $0x58] sm:$0xff] %vm540_vm2, %v1697_v4  ;;  %v573_v48 = vadd.f32 %v572_v36, %v571_v42 }
  0xb8   : > { %v656_v43 = vsel %vm540_vm2, %v629_v28, 0.0  ;;  %v584_v28 = vsel %vm540_vm2, %v1665_v50, 0.0  ;;  %v588_v50 = vsel %vm540_vm2, %v1697_v4, 0.0 }
  0xb9   : > { %v657_v55 = vadd.f32 %v656_v43, %v655_v47 }
  0xba   : > { %v528_v6 = vpop.f32.mrf.mxu3 }
  0xbb   : > { %v486_v7 = vpop.f32.mrf.mxu0  ;;  %v1705_v9 = vadd.f32 %v1650_v40, %v528_v6 }
  0xbc   : > { %v506_v8 = vpop.f32.mrf.mxu1  ;;  %v487_v10 = vadd.f32 %v1650_v40, %v486_v7 }
  0xbd   : > { %v1709_v11 = vadd.f32 %v1650_v40, %v506_v8  ;;  %562 = vst.msk [vmem:[#allocation2 + $0xa8] sm:$0xff] %vm540_vm2, %v1705_v9 }
  0xbe   : > { %545 = vst.msk [vmem:[#allocation2 + $0x20] sm:$0xff] %vm540_vm2, %v487_v10  ;;  %v630_v37 = vmul.f32 %v487_v10, %v487_v10  ;;  %v574_v45 = vsel %vm540_vm2, %v487_v10, 0.0 }
  0xbf   : > { %553 = vst.msk [vmem:[#allocation2 + $0x60] sm:$0xff] %vm540_vm2, %v1709_v11  ;;  %v575_v56 = vadd.f32 %v574_v45, %v573_v48 }
  0xc0   : > { %v658_v49 = vsel %vm540_vm2, %v630_v37, 0.0 }
  0xc1   : > { %v659_v63 = vadd.f32 %v658_v49, %v657_v55 }
  0xc2   : > { %v531_v15 = vpop.f32.mrf.mxu3 }
  0xc3   : > { %v488_v16 = vpop.f32.mrf.mxu0  ;;  %v1736_v23 = vadd.f32 %v1650_v40, %v531_v15 }
  0xc4   : > { %v508_v17 = vpop.f32.mrf.mxu1  ;;  %v489_v18 = vadd.f32 %v1650_v40, %v488_v16 }
  0xc5   : > { %v1728_v19 = vadd.f32 %v1650_v40, %v508_v17  ;;  %563 = vst.msk [vmem:[#allocation2 + $0xb0] sm:$0xff] %vm540_vm2, %v1736_v23 }
  0xc6   : > { %546 = vst.msk [vmem:[#allocation2 + $0x28] sm:$0xff] %vm540_vm2, %v489_v18  ;;  %v631_v46 = vmul.f32 %v489_v18, %v489_v18  ;;  %v576_v52 = vsel %vm540_vm2, %v489_v18, 0.0 }
  0xc7   : > { %554 = vst.msk [vmem:[#allocation2 + $0x68] sm:$0xff] %vm540_vm2, %v1728_v19  ;;  %v577_v0 = vadd.f32 %v576_v52, %v575_v56  ;;  %v639_v45 = vmul.f32 %v1728_v19, %v1728_v19 }
  0xc8   : > { %v660_v57 = vsel %vm540_vm2, %v631_v46, 0.0 }
  0xc9   : > { %v661_v8 = vadd.f32 %v660_v57, %v659_v63  ;;  %v676_v55 = vsel %vm540_vm2, %v639_v45, 0.0  ;;  %v642_v63 = vmul.f32 %v1717_v13, %v1717_v13 }
  0xca   : > { %v533_v29 = vpop.f32.mrf.mxu3 }
  0xcb   : > { %v491_v33 = vpop.f32.mrf.mxu0  ;;  %v1748_v35 = vadd.f32 %v1650_v40, %v533_v29 }
  0xcc   : > { %v511_v34 = vpop.f32.mrf.mxu1  ;;  %v492_v38 = vadd.f32 %v1650_v40, %v491_v33  ;;  %v637_v33 = vmul.f32 %v1697_v4, %v1697_v4  ;;  %v592_v4 = vsel %vm540_vm2, %v1728_v19, 0.0 }
  0xcd   : > { %v1753_v39 = vadd.f32 %v1650_v40, %v511_v34  ;;  %564 = vst.msk [vmem:[#allocation2 + $0xb8] sm:$0xff] %vm540_vm2, %v1748_v35 }
  0xce   : > { %547 = vst.msk [vmem:[#allocation2 + $0x30] sm:$0xff] %vm540_vm2, %v492_v38  ;;  %v632_v54 = vmul.f32 %v492_v38, %v492_v38  ;;  %v578_v58 = vsel %vm540_vm2, %v492_v38, 0.0  ;;  %v638_v38 = vmul.f32 %v1709_v11, %v1709_v11  ;;  %v672_v43 = vsel %vm540_vm2, %v637_v33, 0.0 }
  0xcf   : > { %555 = vst.msk [vmem:[#allocation2 + $0x70] sm:$0xff] %vm540_vm2, %v1753_v39  ;;  %v579_v10 = vadd.f32 %v578_v58, %v577_v0  ;;  %v640_v49 = vmul.f32 %v1753_v39, %v1753_v39 }
  0xd0   : > { %v662_v5 = vsel %vm540_vm2, %v632_v54, 0.0  ;;  %v674_v48 = vsel %vm540_vm2, %v638_v38, 0.0 }
  0xd1   : > { %v663_v17 = vadd.f32 %v662_v5, %v661_v8 }
  0xd2   : > { %v536_v61 = vpop.f32.mrf.mxu3 }
  0xd3   : > { %v493_v1 = vpop.f32.mrf.mxu0  ;;  %v1775_v20 = vadd.f32 %v1650_v40, %v536_v61  ;;  %v678_v61 = vsel %vm540_vm2, %v640_v49, 0.0 }
  0xd4   : > { %v513_v3 = vpop.f32.mrf.mxu1  ;;  %v494_v6 = vadd.f32 %v1650_v40, %v493_v1 }
  0xd5   : > { %v514_v7 = vadd.f32 %v1650_v40, %v513_v3  ;;  %565 = vst.msk [vmem:[#allocation2 + $0xc0] sm:$0xff] %vm540_vm2, %v1775_v20  ;;  %v636_v40 = vmul.f32 %v1680_v59, %v1680_v59  ;;  %v590_v59 = vsel %vm540_vm2, %v1709_v11, 0.0  ;;  %v594_v11 = vsel %vm540_vm2, %v1753_v39, 0.0 }
  0xd6   : > { %548 = vst.msk [vmem:[#allocation2 + $0x38] sm:$0xff] %vm540_vm2, %v494_v6  ;;  %v580_v15 = vsel %vm540_vm2, %v494_v6, 0.0  ;;  %v633_v16 = vmul.f32 %v494_v6, %v494_v6  ;;  %v598_v3 = vsel %vm540_vm2, %v1717_v13, 0.0  ;;  %v643_v39 = vmul.f32 %v1720_v14, %v1720_v14 }
  0xd7   : > { %v581_v18 = vadd.f32 %v580_v15, %v579_v10  ;;  %556 = vst.msk [vmem:[#allocation2 + $0x78] sm:$0xff] %vm540_vm2, %v514_v7  ;;  %v670_v37 = vsel %vm540_vm2, %v636_v40, 0.0  ;;  %v641_v56 = vmul.f32 %v514_v7, %v514_v7  ;;  %v596_v19 = vsel %vm540_vm2, %v514_v7, 0.0 }
  0xd8   : > { %v664_v24 = vsel %vm540_vm2, %v633_v16, 0.0  ;;  %v682_v10 = vsel %vm540_vm2, %v642_v63, 0.0  ;;  %v684_v7 = vsel %vm540_vm2, %v643_v39, 0.0  ;;  %v646_v13 = vmul.f32 %v1693_v2, %v1693_v2 }
  0xd9   : > { %v583_v25 = vadd.f32 %v582_v21, %v581_v18  ;;  %v665_v26 = vadd.f32 %v664_v24, %v663_v17  ;;  %v680_v5 = vsel %vm540_vm2, %v641_v56, 0.0  ;;  %v606_v24 = vsel %vm540_vm2, %v1693_v2, 0.0 }
  0xda   : > { %v538_v29 = vpop.f32.mrf.mxu3  ;;  %v647_v14 = vmul.f32 %v1705_v9, %v1705_v9  ;;  %v610_v2 = vsel %vm540_vm2, %v1736_v23, 0.0 }
  0xdb   : > { %v585_v44 = vadd.f32 %v584_v28, %v583_v25  ;;  %v667_v30 = vadd.f32 %v666_v27, %v665_v26  ;;  %v690_v27 = vsel %vm540_vm2, %v646_v13, 0.0  ;;  %v648_v28 = vmul.f32 %v1736_v23, %v1736_v23 }
  0xdc   : > { %v649_v29 = vmul.f32 %v1748_v35, %v1748_v35 }
  0xdd   : > { %v587_v34 = vadd.f32 %v586_v32, %v585_v44  ;;  %v669_v36 = vadd.f32 %v668_v31, %v667_v30  ;;  %v612_v31 = vsel %vm540_vm2, %v1748_v35, 0.0  ;;  %v614_v32 = vsel %vm540_vm2, %v1775_v20, 0.0 }
  0xde   : > { %v696_v23 = vsel %vm540_vm2, %v649_v29, 0.0 }
  0xdf   : > { %v671_v41 = vadd.f32 %v670_v37, %v669_v36  ;;  %v589_v42 = vadd.f32 %v588_v50, %v587_v34 }
  0xe1   : > { %v591_v46 = vadd.f32 %v590_v59, %v589_v42  ;;  %v673_v47 = vadd.f32 %v672_v43, %v671_v41 }
  0xe3   : > { %v593_v52 = vadd.f32 %v592_v4, %v591_v46  ;;  %v675_v54 = vadd.f32 %v674_v48, %v673_v47  ;;  %v566_v4 = vld [vmem:[#allocation3] sm:$0x1] }
  0xe5   : > { %v595_v57 = vadd.f32 %v594_v11, %v593_v52  ;;  %v677_v58 = vadd.f32 %v676_v55, %v675_v54  ;;  %v625_v52 = vld [vmem:[#allocation4] sm:$0x1] }
  0xe7   : > { %v679_v0 = vadd.f32 %v678_v61, %v677_v58  ;;  %v597_v1 = vadd.f32 %v596_v19, %v595_v57 }
  0xe9   : > { %v681_v6 = vadd.f32 %v680_v5, %v679_v0  ;;  %v599_v8 = vadd.f32 %v598_v3, %v597_v1 }
  0xeb   : > { %v601_v15 = vadd.f32 %v600_v12, %v599_v8  ;;  %v683_v16 = vadd.f32 %v682_v10, %v681_v6 }
  0xed   : > { %v603_v17 = vadd.f32 %v1669_v51, %v601_v15  ;;  %v685_v18 = vadd.f32 %v684_v7, %v683_v16  ;;  %v608_v51 = vsel %vm540_vm2, %v1705_v9, 0.0  ;;  %v694_v9 = vsel %vm540_vm2, %v648_v28, 0.0 }
  0xef   : > { %v605_v21 = vadd.f32 %v1684_v60, %v603_v17  ;;  %v687_v22 = vadd.f32 %v1675_v53, %v685_v18  ;;  %v692_v53 = vsel %vm540_vm2, %v647_v14, 0.0 }
  0xf1   : > { %v689_v25 = vadd.f32 %v1690_v62, %v687_v22  ;;  %v607_v26 = vadd.f32 %v606_v24, %v605_v21  ;;  %v650_v62 = vmul.f32 %v1775_v20, %v1775_v20 }
  0xf3   : > { %v609_v60 = vadd.f32 %v608_v51, %v607_v26  ;;  %v691_v40 = vadd.f32 %v690_v27, %v689_v25  ;;  %v698_v36 = vsel %vm540_vm2, %v650_v62, 0.0 }
  0xf5   : > { %v611_v44 = vadd.f32 %v610_v2, %v609_v60  ;;  %v693_v30 = vadd.f32 %v692_v53, %v691_v40 }
  0xf7   : > { %v613_v33 = vadd.f32 %v612_v31, %v611_v44  ;;  %v695_v34 = vadd.f32 %v694_v9, %v693_v30 }
  0xf9   : > { %v697_v37 = vadd.f32 %v696_v23, %v695_v34  ;;  %v615_v50 = vadd.f32 %v614_v32, %v613_v33 }
  0xfb   : > { %v616_v38 = vrot.slane %v615_v50, 4  ;;  %v699_v41 = vadd.f32 %v698_v36, %v697_v37 }
  0xfd   : > { %v617_v42 = vadd.f32 %v616_v38, %v615_v50  ;;  %v700_v43 = vrot.slane %v699_v41, 4 }
  0xff   : > { %v618_v59 = vrot.slane %v617_v42, 2  ;;  %v701_v45 = vadd.f32 %v700_v43, %v699_v41 }
 0x101   : > { %v619_v46 = vadd.f32 %v618_v59, %v617_v42  ;;  %v702_v47 = vrot.slane %v701_v45, 2 }
 0x103   : > { %v620_v35 = vrot.slane %v619_v46, 1  ;;  %v703_v48 = vadd.f32 %v702_v47, %v701_v45 }
 0x105   : > { %v621_v20 = vadd.f32 %v620_v35, %v619_v46  ;;  %v704_v49 = vrot.slane %v703_v48, 1 }
 0x107   : > { %v622_v54 = vadd.f32 %v621_v20, %v566_v4  ;;  %v705_v55 = vadd.f32 %v704_v49, %v703_v48 }
 0x109   : > { %624 = vst.msk [vmem:[#allocation3] sm:$0x1] %vm623_vm3, %v622_v54  ;;  %v706_v11 = vadd.f32 %v705_v55, %v625_v52 }
 0x10b   : > { %707 = vst.msk [vmem:[#allocation4] sm:$0x1] %vm623_vm3, %v706_v11 }
 0x10c PF: > { %p1304_p6 = scmp.ne.s32.totalorder %s1469_s30, 1 }
 0x10e   : > { %711 = sbr.rel (%p1304_p6) target bundleno = 545 (0x221), region = 60 }
 0x113   : > { %v1337_v56 = vld [vmem:[%s2240_s5 + $0x8] sm:$0xff]  ;;  %v1336_v61 = vld [vmem:[%s2240_s5] sm:$0xff]  ;;  %v747_v22 = vld [vmem:[#allocation2 + $0x30] sm:$0xff]  ;;  %vm880_vm7 = vcmask 261120   ;;  %vm993_vm8 = vcmask 64512   ;;  %vm715_vm9 = vcmask 57344  }
 0x114   : > { %v718_v57 = vld [vmem:[#allocation3] sm:$0x1]  ;;  %v719_v58 = vld [vmem:[#allocation4] sm:$0x1]  ;;  %926 = vmatpush.bf16.msra.mxu0 %v1337_v56  ;;  %1341 = vmatpush.bf16.msra.mxu1 %v1337_v56  ;;  %v720_v15 = vld [vmem:[%s2238_s3] sm:$0x1] }
 0x115   : > { %v722_v63 = vmul.f32 0.005, %v718_v57  ;;  %v723_v19 = vmul.f32 0.005, %v719_v58  ;;  %1342 = vmatpush.bf16.msra.mxu2 %v1337_v56  ;;  %1343 = vmatpush.bf16.msra.mxu3 %v1337_v56  ;;  %v721_v17 = vld [vmem:[%s2239_s4] sm:$0x1] }
 0x116   : > { %v741_v13 = vld [vmem:[#allocation2] sm:$0xff]  ;;  %v742_v21 = vld [vmem:[#allocation2 + $0x8] sm:$0xff]  ;;  %v748_v25 = vld [vmem:[#allocation2 + $0x38] sm:$0xff] }
 0x117   : > { %v724_v0 = vmul.f32 %v722_v63, %v722_v63  ;;  %v755_v26 = vld [vmem:[#allocation2 + $0x70] sm:$0xff]  ;;  %v756_v27 = vld [vmem:[#allocation2 + $0x78] sm:$0xff]  ;;  %v749_v43 = vld [vmem:[#allocation2 + $0x40] sm:$0xff] }
 0x118   : > { %927 = vmatpush.bf16.msra.mxu0 %v1336_v61  ;;  %1344 = vmatpush.bf16.msra.mxu1 %v1336_v61  ;;  %v743_v50 = vld [vmem:[#allocation2 + $0x10] sm:$0xff]  ;;  %v744_v38 = vld [vmem:[#allocation2 + $0x18] sm:$0xff]  ;;  %v750_v59 = vld [vmem:[#allocation2 + $0x48] sm:$0xff] }
 0x119   : > { %v725_v1 = vsub.f32 %v723_v19, %v724_v0  ;;  %1345 = vmatpush.bf16.msra.mxu2 %v1336_v61  ;;  %1346 = vmatpush.bf16.msra.mxu3 %v1336_v61  ;;  %v757_v47 = vld [vmem:[#allocation2 + $0x80] sm:$0xff]  ;;  %v758_v35 = vld [vmem:[#allocation2 + $0x88] sm:$0xff] }
 0x11b   : > { %v726_v3 = vmax.f32 %v725_v1, 0.0  ;;  %v763_v1 = vld [vmem:[#allocation2 + $0xb0] sm:$0xff] }
 0x11d   : > { %v727_v5 = vadd.f32 1e-05, %v726_v3  ;;  %v764_v3 = vld [vmem:[#allocation2 + $0xb8] sm:$0xff] }
 0x11f   : > { %1389 = vrsqrt.f32 %v727_v5  ;;  %vm734_vm4 = vweird.f32 %v727_v5 }
 0x125   : > { %v1390_v39 = vpop.eup %1389 }
 0x126   : > { %v729_v6 = vmul.f32 %v1390_v39, %v727_v5  ;;  %vm735_vm5 = vweird.f32 %v1390_v39 }
 0x127   : > { %vm736_vm6 = vmor %vm734_vm4, %vm735_vm5 }
 0x128   : > { %v730_v8 = vmul.f32 %v1390_v39, %v729_v6 }
 0x12a   : > { %v731_v10 = vmul.f32 0.5, %v730_v8 }
 0x12c   : > { %v732_v12 = vsub.f32 1.5, %v731_v10 }
 0x12e   : > { %v733_v16 = vmul.f32 %v1390_v39, %v732_v12 }
 0x130   : > { %v737_v7 = vsel %vm736_vm6, %v1390_v39, %v733_v16 }
 0x131   : > { %v738_v18 = vmul.f32 %v737_v7, %v720_v15 }
 0x133   : > { %v739_v24 = vmul.f32 %v738_v18, %v722_v63  ;;  %v1867_v14 = vperm.slane %v738_v18, 0  ;;  %v745_v18 = vld [vmem:[#allocation2 + $0x20] sm:$0xff] }
 0x135   : > { %v740_v51 = vsub.f32 %v721_v17, %v739_v24  ;;  %v769_v28 = vmul.f32 %v1867_v14, %v741_v13  ;;  %v770_v60 = vmul.f32 %v1867_v14, %v742_v21  ;;  %v775_v40 = vmul.f32 %v1867_v14, %v747_v22  ;;  %v746_v24 = vld [vmem:[#allocation2 + $0x28] sm:$0xff] }
 0x136   : > { %v776_v53 = vmul.f32 %v1867_v14, %v748_v25  ;;  %v783_v2 = vmul.f32 %v1867_v14, %v755_v26  ;;  %v784_v29 = vmul.f32 %v1867_v14, %v756_v27  ;;  %v771_v4 = vmul.f32 %v1867_v14, %v743_v50  ;;  %v751_v25 = vld [vmem:[#allocation2 + $0x50] sm:$0xff]  ;;  %v752_v26 = vld [vmem:[#allocation2 + $0x58] sm:$0xff] }
 0x137   : > { %v1875_v62 = vperm.slane %v740_v51, 0  ;;  %v772_v20 = vmul.f32 %v1867_v14, %v744_v38  ;;  %v777_v49 = vmul.f32 %v1867_v14, %v749_v43  ;;  %v778_v52 = vmul.f32 %v1867_v14, %v750_v59  ;;  %v759_v27 = vld [vmem:[#allocation2 + $0x90] sm:$0xff]  ;;  %v760_v51 = vld [vmem:[#allocation2 + $0x98] sm:$0xff] }
 0x138   : > { %v785_v54 = vmul.f32 %v1867_v14, %v757_v47  ;;  %v786_v55 = vmul.f32 %v1867_v14, %v758_v35  ;;  %v791_v6 = vmul.f32 %v1867_v14, %v763_v1  ;;  %v792_v8 = vmul.f32 %v1867_v14, %v764_v3 }
 0x139   : > { %v797_v44 = vadd.f32 %v1875_v62, %v769_v28  ;;  %v798_v30 = vadd.f32 %v1875_v62, %v770_v60  ;;  %v803_v9 = vadd.f32 %v1875_v62, %v775_v40  ;;  %v804_v31 = vadd.f32 %v1875_v62, %v776_v53 }
 0x13a   : > { %v811_v32 = vadd.f32 %v1875_v62, %v783_v2  ;;  %v812_v33 = vadd.f32 %v1875_v62, %v784_v29  ;;  %v799_v11 = vadd.f32 %v1875_v62, %v771_v4  ;;  %v800_v56 = vadd.f32 %v1875_v62, %v772_v20  ;;  %v754_v4 = vld [vmem:[#allocation2 + $0x68] sm:$0xff] }
 0x13b   : > { %v822_v34 = vmax.f32 %v797_v44, 0.0  ;;  %v823_v23 = vmax.f32 %v798_v30, 0.0  ;;  %v828_v36 = vmax.f32 %v803_v9, 0.0  ;;  %v829_v37 = vmax.f32 %v804_v31, 0.0  ;;  %v765_v30 = vld [vmem:[#allocation2 + $0xc0] sm:$0xff] }
 0x13c   : > { %v836_v41 = vmax.f32 %v811_v32, 0.0  ;;  %v837_v42 = vmax.f32 %v812_v33, 0.0  ;;  %v805_v57 = vadd.f32 %v1875_v62, %v777_v49  ;;  %v806_v58 = vadd.f32 %v1875_v62, %v778_v52  ;;  %v761_v49 = vld [vmem:[#allocation2 + $0xa0] sm:$0xff]  ;;  %v762_v52 = vld [vmem:[#allocation2 + $0xa8] sm:$0xff] }
 0x13d   : > { %v847_v45 = vpack.c.bf16 %v823_v23, %v822_v34  ;;  %v850_v46 = vpack.c.bf16 %v829_v37, %v828_v36  ;;  %v813_v61 = vadd.f32 %v1875_v62, %v785_v54  ;;  %v814_v63 = vadd.f32 %v1875_v62, %v786_v55 }
 0x13e   : > { %v854_v48 = vpack.c.bf16 %v837_v42, %v836_v41  ;;  %v824_v19 = vmax.f32 %v799_v11, 0.0  ;;  %v825_v0 = vmax.f32 %v800_v56, 0.0  ;;  %v830_v5 = vmax.f32 %v805_v57, 0.0 }
 0x13f   : > { %1313 = vmatmul.msk.bf16.vlgmr.msra.gmra.mxu0 %vm880_vm7, %v847_v45  ;;  %1316 = vmatmul.msk.bf16.vlgmr.msra.gmra.mxu1 %vm880_vm7, %v850_v46  ;;  %v831_v39 = vmax.f32 %v806_v58, 0.0  ;;  %v838_v10 = vmax.f32 %v813_v61, 0.0  ;;  %v839_v12 = vmax.f32 %v814_v63, 0.0  ;;  %v819_v15 = vadd.f32 %v1875_v62, %v791_v6 }
 0x140   : > { %1320 = vmatmul.msk.bf16.vlgmr.msra.gmra.mxu2 %vm880_vm7, %v854_v48  ;;  %v820_v16 = vadd.f32 %v1875_v62, %v792_v8  ;;  %v848_v7 = vpack.c.bf16 %v825_v0, %v824_v19  ;;  %v773_v60 = vmul.f32 %v1867_v14, %v745_v18  ;;  %v774_v40 = vmul.f32 %v1867_v14, %v746_v24  ;;  %v753_v48 = vld [vmem:[#allocation2 + $0x60] sm:$0xff] }
 0x141   : > { %v851_v17 = vpack.c.bf16 %v831_v39, %v830_v5  ;;  %v844_v13 = vmax.f32 %v819_v15, 0.0  ;;  %v855_v22 = vpack.c.bf16 %v839_v12, %v838_v10  ;;  %v779_v53 = vmul.f32 %v1867_v14, %v751_v25 }
 0x142   : > { %v845_v21 = vmax.f32 %v820_v16, 0.0  ;;  %v780_v2 = vmul.f32 %v1867_v14, %v752_v26  ;;  %v787_v29 = vmul.f32 %v1867_v14, %v759_v27  ;;  %v788_v44 = vmul.f32 %v1867_v14, %v760_v51 }
 0x143   : > { %v793_v9 = vmul.f32 %v1867_v14, %v765_v30  ;;  %v801_v31 = vadd.f32 %v1875_v62, %v773_v60  ;;  %v802_v32 = vadd.f32 %v1875_v62, %v774_v40  ;;  %v807_v33 = vadd.f32 %v1875_v62, %v779_v53 }
 0x144   : > { %v858_v28 = vpack.c.bf16 %v845_v21, %v844_v13  ;;  %v808_v34 = vadd.f32 %v1875_v62, %v780_v2  ;;  %v815_v23 = vadd.f32 %v1875_v62, %v787_v29  ;;  %v816_v36 = vadd.f32 %v1875_v62, %v788_v44 }
 0x145   : > { %v821_v37 = vadd.f32 %v1875_v62, %v793_v9  ;;  %v826_v50 = vmax.f32 %v801_v31, 0.0  ;;  %v827_v38 = vmax.f32 %v802_v32, 0.0  ;;  %v832_v41 = vmax.f32 %v807_v33, 0.0 }
 0x146   : > { %1324 = vmatmul.msk.bf16.vlgmr.msra.gmra.mxu3 %vm880_vm7, %v858_v28  ;;  %v833_v42 = vmax.f32 %v808_v34, 0.0  ;;  %v840_v43 = vmax.f32 %v815_v23, 0.0  ;;  %v841_v59 = vmax.f32 %v816_v36, 0.0  ;;  %v781_v54 = vmul.f32 %v1867_v14, %v753_v48 }
 0x147   : > { %v846_v45 = vmax.f32 %v821_v37, 0.0  ;;  %v849_v46 = vpack.c.bf16 %v827_v38, %v826_v50  ;;  %v782_v55 = vmul.f32 %v1867_v14, %v754_v4  ;;  %v789_v11 = vmul.f32 %v1867_v14, %v761_v49 }
 0x148   : > { %v852_v47 = vpack.c.bf16 %v833_v42, %v832_v41  ;;  %v856_v35 = vpack.c.bf16 %v841_v59, %v840_v43  ;;  %v790_v56 = vmul.f32 %v1867_v14, %v762_v52  ;;  %v809_v57 = vadd.f32 %v1875_v62, %v781_v54  ;;  %v1937_v14 = vld [vmem:[%s2241_s6] ss:$0 sm:$0xff] }
 0x149   : > { %v859_v20 = vpack.c.bf16 %v846_v45, %v846_v45  ;;  %v810_v58 = vadd.f32 %v1875_v62, %v782_v55  ;;  %v817_v61 = vadd.f32 %v1875_v62, %v789_v11 }
 0x14a   : > { %v818_v63 = vadd.f32 %v1875_v62, %v790_v56  ;;  %v834_v19 = vmax.f32 %v809_v57, 0.0 }
 0x14b   : > { %v835_v0 = vmax.f32 %v810_v58, 0.0  ;;  %v842_v1 = vmax.f32 %v817_v61, 0.0 }
 0x14c   : > { %v843_v3 = vmax.f32 %v818_v63, 0.0 }
 0x14d   : > { %v853_v5 = vpack.c.bf16 %v835_v0, %v834_v19 }
 0x14e   : > { %v857_v39 = vpack.c.bf16 %v843_v3, %v842_v1 }
 0x14f   : > { %1314 = vmatmul.msk.bf16.gmra.mxu0 %vm880_vm7, %v848_v7  ;;  %1317 = vmatmul.msk.bf16.gmra.mxu1 %vm880_vm7, %v851_v17 }
 0x150   : > { %1321 = vmatmul.msk.bf16.gmra.mxu2 %vm880_vm7, %v855_v22 }
 0x156   : > { %1325 = vmatmul.msk.bf16.gmra.mxu3 %vm880_vm7, %v859_v20 }
 0x15f   : > { %1315 = vmatmul.msk.bf16.gmra.mxu0 %vm880_vm7, %v849_v46  ;;  %1318 = vmatmul.msk.bf16.gmra.mxu1 %vm880_vm7, %v852_v47 }
 0x160   : > { %1322 = vmatmul.msk.bf16.gmra.mxu2 %vm880_vm7, %v856_v35 }
 0x16f   : > { %1319 = vmatmul.msk.bf16.gmra.mxu1 %vm880_vm7, %v853_v5 }
 0x170   : > { %1323 = vmatmul.msk.bf16.gmra.mxu2 %vm880_vm7, %v857_v39 }
 0x1bc   : > { %v929_v6 = vpop.f32.mrf.mxu0  ;;  %v944_v8 = vpop.f32.mrf.mxu1 }
 0x1bd   : > { %v930_v62 = vadd.f32 %v1937_v14, %v929_v6  ;;  %v1941_v10 = vadd.f32 %v1937_v14, %v944_v8 }
 0x1bf   : > { %994 = vst.msk [vmem:[%s2242_s7] sm:$0xff] %vm993_vm8, %v930_v62  ;;  %v1079_v31 = vmul.f32 %v930_v62, %v930_v62  ;;  %v1020_v41 = vsel %vm993_vm8, %v930_v62, 0.0  ;;  %v1085_v5 = vmul.f32 %v1941_v10, %v1941_v10 }
 0x1c0   : > { %1000 = vst.msk [vmem:[%s2242_s7 + $0x30] sm:$0xff] %vm993_vm8, %v1941_v10 }
 0x1c1   : > { %v1104_v46 = vsel %vm993_vm8, %v1079_v31, 0.0 }
 0x1c3   : > { %v964_v12 = vpop.f32.mrf.mxu2 }
 0x1c4   : > { %v931_v15 = vpop.f32.mrf.mxu0  ;;  %v946_v16 = vpop.f32.mrf.mxu1  ;;  %v1953_v7 = vadd.f32 %v1937_v14, %v964_v12 }
 0x1c5   : > { %v932_v17 = vadd.f32 %v1937_v14, %v931_v15  ;;  %v1957_v18 = vadd.f32 %v1937_v14, %v946_v16  ;;  %v1031_v15 = vsel %vm993_vm8, %v1941_v10, 0.0 }
 0x1c6   : > { %1008 = vst.msk [vmem:[%s2242_s7 + $0x70] sm:$0xff] %vm993_vm8, %v1953_v7 }
 0x1c7   : > { %995 = vst.msk [vmem:[%s2242_s7 + $0x8] sm:$0xff] %vm993_vm8, %v932_v17  ;;  %v1080_v44 = vmul.f32 %v932_v17, %v932_v17  ;;  %v1021_v32 = vsel %vm993_vm8, %v932_v17, 0.0  ;;  %v1086_v39 = vmul.f32 %v1957_v18, %v1957_v18 }
 0x1c8   : > { %1001 = vst.msk [vmem:[%s2242_s7 + $0x38] sm:$0xff] %vm993_vm8, %v1957_v18  ;;  %v1022_v45 = vadd.f32 %v1021_v32, %v1020_v41 }
 0x1c9   : > { %v984_v51 = vpop.f32.mrf.mxu3  ;;  %v1105_v42 = vsel %vm993_vm8, %v1080_v44, 0.0 }
 0x1ca   : > { %v2016_v29 = vadd.f32 %v1937_v14, %v984_v51  ;;  %v1106_v4 = vadd.f32 %v1105_v42, %v1104_v46  ;;  %v1480_v42 = vmov 0.0  }
 0x1cb   : > { %v966_v13 = vpop.f32.mrf.mxu2  ;;  %716 = vst.msk [vmem:[#allocation5] sm:$0x1] %vm715_vm9, %v1480_v42 }
 0x1cc   : > { %v934_v21 = vpop.f32.mrf.mxu0  ;;  %v949_v22 = vpop.f32.mrf.mxu1  ;;  %v1974_v24 = vadd.f32 %v1937_v14, %v966_v13  ;;  %1016 = vst.msk [vmem:[%s2242_s7 + $0xb0] sm:$0xff] %vm993_vm8, %v2016_v29 }
 0x1cd   : > { %v935_v25 = vadd.f32 %v1937_v14, %v934_v21  ;;  %v1978_v26 = vadd.f32 %v1937_v14, %v949_v22  ;;  %v1115_v21 = vsel %vm993_vm8, %v1085_v5, 0.0  ;;  %v1033_v22 = vsel %vm993_vm8, %v1957_v18, 0.0  ;;  %717 = vst.msk [vmem:[#allocation7] sm:$0x1] %vm715_vm9, %v1480_v42 }
 0x1ce   : > { %1009 = vst.msk [vmem:[%s2242_s7 + $0x78] sm:$0xff] %vm993_vm8, %v1974_v24  ;;  %v1047_v5 = vsel %vm993_vm8, %v1953_v7, 0.0 }
 0x1cf   : > { %996 = vst.msk [vmem:[%s2242_s7 + $0x10] sm:$0xff] %vm993_vm8, %v935_v25  ;;  %v1081_v36 = vmul.f32 %v935_v25, %v935_v25  ;;  %v1023_v43 = vsel %vm993_vm8, %v935_v25, 0.0  ;;  %v1117_v25 = vsel %vm993_vm8, %v1086_v39, 0.0  ;;  %v1094_v39 = vmul.f32 %v1974_v24, %v1974_v24 }
 0x1d0   : > { %1002 = vst.msk [vmem:[%s2242_s7 + $0x40] sm:$0xff] %vm993_vm8, %v1978_v26  ;;  %v1024_v20 = vadd.f32 %v1023_v43, %v1022_v45 }
 0x1d1   : > { %v986_v9 = vpop.f32.mrf.mxu3  ;;  %v1107_v47 = vsel %vm993_vm8, %v1081_v36, 0.0 }
 0x1d2   : > { %v2032_v38 = vadd.f32 %v1937_v14, %v986_v9  ;;  %v1108_v11 = vadd.f32 %v1107_v47, %v1106_v4 }
 0x1d3   : > { %v969_v27 = vpop.f32.mrf.mxu2 }
 0x1d4   : > { %v936_v28 = vpop.f32.mrf.mxu0  ;;  %v951_v60 = vpop.f32.mrf.mxu1  ;;  %v1995_v40 = vadd.f32 %v1937_v14, %v969_v27  ;;  %1017 = vst.msk [vmem:[%s2242_s7 + $0xb8] sm:$0xff] %vm993_vm8, %v2032_v38  ;;  %v1087_v27 = vmul.f32 %v1978_v26, %v1978_v26 }
 0x1d5   : > { %v937_v53 = vadd.f32 %v1937_v14, %v936_v28  ;;  %v1999_v2 = vadd.f32 %v1937_v14, %v951_v60  ;;  %v1035_v60 = vsel %vm993_vm8, %v1978_v26, 0.0 }
 0x1d6   : > { %1010 = vst.msk [vmem:[%s2242_s7 + $0x80] sm:$0xff] %vm993_vm8, %v1995_v40 }
 0x1d7   : > { %997 = vst.msk [vmem:[%s2242_s7 + $0x18] sm:$0xff] %vm993_vm8, %v937_v53  ;;  %v1082_v59 = vmul.f32 %v937_v53, %v937_v53  ;;  %v1025_v35 = vsel %vm993_vm8, %v937_v53, 0.0  ;;  %v1088_v9 = vmul.f32 %v1999_v2, %v1999_v2 }
 0x1d8   : > { %1003 = vst.msk [vmem:[%s2242_s7 + $0x48] sm:$0xff] %vm993_vm8, %v1999_v2  ;;  %v1026_v56 = vadd.f32 %v1025_v35, %v1024_v20 }
 0x1d9   : > { %v1109_v49 = vsel %vm993_vm8, %v1082_v59, 0.0  ;;  %v989_v55 = vpop.f32.mrf.mxu3  ;;  %v1121_v43 = vsel %vm993_vm8, %v1088_v9, 0.0 }
 0x1da   : > { %v1110_v1 = vadd.f32 %v1109_v49, %v1108_v11  ;;  %v2108_v26 = vadd.f32 %v1937_v14, %v989_v55 }
 0x1db   : > { %v971_v30 = vpop.f32.mrf.mxu2 }
 0x1dc   : > { %v939_v33 = vpop.f32.mrf.mxu0  ;;  %v954_v34 = vpop.f32.mrf.mxu1  ;;  %v2025_v23 = vadd.f32 %v1937_v14, %v971_v30  ;;  %1018 = vst.msk [vmem:[%s2242_s7 + $0xc0] sm:$0xff] %vm993_vm8, %v2108_v26 }
 0x1dd   : > { %v940_v37 = vadd.f32 %v1937_v14, %v939_v33  ;;  %v2029_v50 = vadd.f32 %v1937_v14, %v954_v34  ;;  %v1119_v33 = vsel %vm993_vm8, %v1087_v27, 0.0  ;;  %v1037_v34 = vsel %vm993_vm8, %v1999_v2, 0.0 }
 0x1de   : > { %1011 = vst.msk [vmem:[%s2242_s7 + $0x88] sm:$0xff] %vm993_vm8, %v2025_v23  ;;  %v1096_v27 = vmul.f32 %v2025_v23, %v2025_v23 }
 0x1df   : > { %998 = vst.msk [vmem:[%s2242_s7 + $0x20] sm:$0xff] %vm993_vm8, %v940_v37  ;;  %v1083_v48 = vmul.f32 %v940_v37, %v940_v37  ;;  %v1027_v52 = vsel %vm993_vm8, %v940_v37, 0.0  ;;  %v1089_v36 = vmul.f32 %v2029_v50, %v2029_v50  ;;  %v1039_v59 = vsel %vm993_vm8, %v2029_v50, 0.0 }
 0x1e0   : > { %1004 = vst.msk [vmem:[%s2242_s7 + $0x50] sm:$0xff] %vm993_vm8, %v2029_v50  ;;  %v1028_v3 = vadd.f32 %v1027_v52, %v1026_v56 }
 0x1e1   : > { %v1111_v63 = vsel %vm993_vm8, %v1083_v48, 0.0  ;;  %v991_v28 = vpop.f32.mrf.mxu3  ;;  %v1123_v47 = vsel %vm993_vm8, %v1089_v36, 0.0 }
 0x1e2   : > { %v1112_v62 = vadd.f32 %v1111_v63, %v1110_v1 }
 0x1e3   : > { %v974_v54 = vpop.f32.mrf.mxu2 }
 0x1e4   : > { %v941_v57 = vpop.f32.mrf.mxu0  ;;  %v956_v58 = vpop.f32.mrf.mxu1  ;;  %v2062_v61 = vadd.f32 %v1937_v14, %v974_v54 }
 0x1e5   : > { %v942_v19 = vadd.f32 %v1937_v14, %v941_v57  ;;  %v957_v0 = vadd.f32 %v1937_v14, %v956_v58  ;;  %v1093_v58 = vmul.f32 %v1953_v7, %v1953_v7 }
 0x1e6   : > { %1012 = vst.msk [vmem:[%s2242_s7 + $0x90] sm:$0xff] %vm993_vm8, %v2062_v61 }
 0x1e7   : > { %999 = vst.msk [vmem:[%s2242_s7 + $0x28] sm:$0xff] %vm993_vm8, %v942_v19  ;;  %v1029_v6 = vsel %vm993_vm8, %v942_v19, 0.0  ;;  %v1084_v8 = vmul.f32 %v942_v19, %v942_v19  ;;  %v1090_v45 = vmul.f32 %v957_v0, %v957_v0  ;;  %v1041_v35 = vsel %vm993_vm8, %v957_v0, 0.0 }
 0x1e8   : > { %v1030_v12 = vadd.f32 %v1029_v6, %v1028_v3  ;;  %1005 = vst.msk [vmem:[%s2242_s7 + $0x58] sm:$0xff] %vm993_vm8, %v957_v0 }
 0x1e9   : > { %v1113_v16 = vsel %vm993_vm8, %v1084_v8, 0.0  ;;  %v1125_v54 = vsel %vm993_vm8, %v1090_v45, 0.0 }
 0x1ea   : > { %v1032_v17 = vadd.f32 %v1031_v15, %v1030_v12  ;;  %v1114_v13 = vadd.f32 %v1113_v16, %v1112_v62  ;;  %v1131_v12 = vsel %vm993_vm8, %v1093_v58, 0.0  ;;  %v1049_v15 = vsel %vm993_vm8, %v1974_v24, 0.0 }
 0x1eb   : > { %v976_v51 = vpop.f32.mrf.mxu2  ;;  %v1095_v16 = vmul.f32 %v1995_v40, %v1995_v40 }
 0x1ec   : > { %v1034_v10 = vadd.f32 %v1033_v22, %v1032_v17  ;;  %v1116_v53 = vadd.f32 %v1115_v21, %v1114_v13  ;;  %v959_v44 = vpop.f32.mrf.mxu1  ;;  %v2097_v30 = vadd.f32 %v1937_v14, %v976_v51  ;;  %v1133_v22 = vsel %vm993_vm8, %v1094_v39, 0.0 }
 0x1ed   : > { %v960_v18 = vadd.f32 %v1937_v14, %v959_v44  ;;  %v1135_v24 = vsel %vm993_vm8, %v1095_v16, 0.0  ;;  %v1055_v44 = vsel %vm993_vm8, %v2062_v61, 0.0 }
 0x1ee   : > { %v1118_v31 = vadd.f32 %v1117_v25, %v1116_v53  ;;  %v1036_v32 = vadd.f32 %v1035_v60, %v1034_v10  ;;  %1013 = vst.msk [vmem:[%s2242_s7 + $0x98] sm:$0xff] %vm993_vm8, %v2097_v30  ;;  %v1051_v25 = vsel %vm993_vm8, %v1995_v40, 0.0  ;;  %v1097_v60 = vmul.f32 %v2062_v61, %v2062_v61 }
 0x1ef   : > { %1006 = vst.msk [vmem:[%s2242_s7 + $0x60] sm:$0xff] %vm993_vm8, %v960_v18  ;;  %v1091_v48 = vmul.f32 %v960_v18, %v960_v18  ;;  %v1043_v55 = vsel %vm993_vm8, %v960_v18, 0.0  ;;  %v1137_v53 = vsel %vm993_vm8, %v1096_v27, 0.0  ;;  %v1098_v9 = vmul.f32 %v2097_v30, %v2097_v30 }
 0x1f0   : > { %v1038_v37 = vadd.f32 %v1037_v34, %v1036_v32  ;;  %v1120_v41 = vadd.f32 %v1119_v33, %v1118_v31  ;;  %v1139_v32 = vsel %vm993_vm8, %v1097_v60, 0.0 }
 0x1f1   : > { %v1127_v63 = vsel %vm993_vm8, %v1091_v48, 0.0 }
 0x1f2   : > { %v1040_v2 = vadd.f32 %v1039_v59, %v1038_v37  ;;  %v1122_v46 = vadd.f32 %v1121_v43, %v1120_v41  ;;  %v1141_v37 = vsel %vm993_vm8, %v1098_v9, 0.0  ;;  %v1101_v59 = vmul.f32 %v2016_v29, %v2016_v29 }
 0x1f3   : > { %v979_v4 = vpop.f32.mrf.mxu2 }
 0x1f4   : > { %v1042_v20 = vadd.f32 %v1041_v35, %v1040_v2  ;;  %v1124_v49 = vadd.f32 %v1123_v47, %v1122_v46  ;;  %v961_v50 = vpop.f32.mrf.mxu1  ;;  %v980_v52 = vadd.f32 %v1937_v14, %v979_v4  ;;  %v1102_v35 = vmul.f32 %v2032_v38, %v2032_v38 }
 0x1f5   : > { %v962_v11 = vadd.f32 %v1937_v14, %v961_v50  ;;  %v1103_v4 = vmul.f32 %v2108_v26, %v2108_v26  ;;  %v1147_v50 = vsel %vm993_vm8, %v1101_v59, 0.0 }
 0x1f6   : > { %v1126_v56 = vadd.f32 %v1125_v54, %v1124_v49  ;;  %v1044_v57 = vadd.f32 %v1043_v55, %v1042_v20  ;;  %1014 = vst.msk [vmem:[%s2242_s7 + $0xa0] sm:$0xff] %vm993_vm8, %v980_v52  ;;  %v1099_v33 = vmul.f32 %v980_v52, %v980_v52  ;;  %v1059_v41 = vsel %vm993_vm8, %v980_v52, 0.0 }
 0x1f7   : > { %1007 = vst.msk [vmem:[%s2242_s7 + $0x68] sm:$0xff] %vm993_vm8, %v962_v11  ;;  %v1045_v19 = vsel %vm993_vm8, %v962_v11, 0.0  ;;  %v1092_v0 = vmul.f32 %v962_v11, %v962_v11  ;;  %v1065_v52 = vsel %vm993_vm8, %v2032_v38, 0.0  ;;  %v1067_v54 = vsel %vm993_vm8, %v2108_v26, 0.0 }
 0x1f8   : > { %v1128_v1 = vadd.f32 %v1127_v63, %v1126_v56  ;;  %v1046_v3 = vadd.f32 %v1045_v19, %v1044_v57  ;;  %v1143_v45 = vsel %vm993_vm8, %v1099_v33, 0.0  ;;  %v1149_v11 = vsel %vm993_vm8, %v1102_v35, 0.0 }
 0x1f9   : > { %v1129_v6 = vsel %vm993_vm8, %v1092_v0, 0.0  ;;  %v1151_v56 = vsel %vm993_vm8, %v1103_v4, 0.0 }
 0x1fa   : > { %v1048_v8 = vadd.f32 %v1047_v5, %v1046_v3  ;;  %v1130_v62 = vadd.f32 %v1129_v6, %v1128_v1 }
 0x1fb   : > { %v981_v17 = vpop.f32.mrf.mxu2 }
 0x1fc   : > { %v1050_v13 = vadd.f32 %v1049_v15, %v1048_v8  ;;  %v1132_v21 = vadd.f32 %v1131_v12, %v1130_v62  ;;  %v982_v7 = vadd.f32 %v1937_v14, %v981_v17  ;;  %v1053_v14 = vsel %vm993_vm8, %v2025_v23, 0.0  ;;  %v1019_v62 = vld [vmem:[#allocation5] sm:$0x1]  ;;  %v1078_v15 = vld [vmem:[#allocation7] sm:$0x1] }
 0x1fd   : > { %v1057_v23 = vsel %vm993_vm8, %v2097_v30, 0.0  ;;  %v1063_v30 = vsel %vm993_vm8, %v2016_v29, 0.0 }
 0x1fe   : > { %v1052_v51 = vadd.f32 %v1051_v25, %v1050_v13  ;;  %v1134_v28 = vadd.f32 %v1133_v22, %v1132_v21  ;;  %1015 = vst.msk [vmem:[%s2242_s7 + $0xa8] sm:$0xff] %vm993_vm8, %v982_v7  ;;  %v1100_v42 = vmul.f32 %v982_v7, %v982_v7  ;;  %v1061_v2 = vsel %vm993_vm8, %v982_v7, 0.0 }
 0x200   : > { %v1136_v10 = vadd.f32 %v1135_v24, %v1134_v28  ;;  %v1054_v40 = vadd.f32 %v1053_v14, %v1052_v51  ;;  %v1145_v48 = vsel %vm993_vm8, %v1100_v42, 0.0 }
 0x202   : > { %v1056_v18 = vadd.f32 %v1055_v44, %v1054_v40  ;;  %v1138_v31 = vadd.f32 %v1137_v53, %v1136_v10 }
 0x204   : > { %v1058_v34 = vadd.f32 %v1057_v23, %v1056_v18  ;;  %v1140_v36 = vadd.f32 %v1139_v32, %v1138_v31 }
 0x206   : > { %v1060_v43 = vadd.f32 %v1059_v41, %v1058_v34  ;;  %v1142_v61 = vadd.f32 %v1141_v37, %v1140_v36 }
 0x208   : > { %v1144_v46 = vadd.f32 %v1143_v45, %v1142_v61  ;;  %v1062_v47 = vadd.f32 %v1061_v2, %v1060_v43 }
 0x20a   : > { %v1064_v20 = vadd.f32 %v1063_v30, %v1062_v47  ;;  %v1146_v49 = vadd.f32 %v1145_v48, %v1144_v46 }
 0x20c   : > { %v1148_v55 = vadd.f32 %v1147_v50, %v1146_v49  ;;  %v1066_v29 = vadd.f32 %v1065_v52, %v1064_v20 }
 0x20e   : > { %v1068_v57 = vadd.f32 %v1067_v54, %v1066_v29  ;;  %v1150_v58 = vadd.f32 %v1149_v11, %v1148_v55 }
 0x210   : > { %v1069_v63 = vrot.slane %v1068_v57, 4  ;;  %v1152_v19 = vadd.f32 %v1151_v56, %v1150_v58 }
 0x212   : > { %v1070_v0 = vadd.f32 %v1069_v63, %v1068_v57  ;;  %v1153_v1 = vrot.slane %v1152_v19, 4 }
 0x214   : > { %v1071_v3 = vrot.slane %v1070_v0, 2  ;;  %v1154_v5 = vadd.f32 %v1153_v1, %v1152_v19 }
 0x216   : > { %v1072_v39 = vadd.f32 %v1071_v3, %v1070_v0  ;;  %v1155_v6 = vrot.slane %v1154_v5, 2 }
 0x218   : > { %v1073_v38 = vrot.slane %v1072_v39, 1  ;;  %v1156_v8 = vadd.f32 %v1155_v6, %v1154_v5 }
 0x21a   : > { %v1074_v26 = vadd.f32 %v1073_v38, %v1072_v39  ;;  %v1157_v12 = vrot.slane %v1156_v8, 1 }
 0x21c   : > { %v1075_v16 = vadd.f32 %v1074_v26, %v1019_v62  ;;  %v1158_v17 = vadd.f32 %v1157_v12, %v1156_v8 }
 0x21e   : > { %1077 = vst.msk [vmem:[#allocation5] sm:$0x1] %vm715_vm9, %v1075_v16  ;;  %v1159_v13 = vadd.f32 %v1158_v17, %v1078_v15 }
 0x220   : > { %1160 = vst.msk [vmem:[#allocation7] sm:$0x1] %vm715_vm9, %v1159_v13 }
 0x221 PF: > { %p2204_p7 = scmp.eq.s32.totalorder %s1279_s12, 1  ;;  %s1180_s15 = sshll.u32 %s2243_s8, 4  ;;  %s1181_s15 = int_to_ptr.hbm [resolvable:$true] %s1180_s15 }
 0x222   : > { %s1481_s16 = smov [#allocation5]   ;;  %s1482_s18 = smov [#allocation7]  }
 0x223   : > { %s1178_s17 = sshll.u32 %s1481_s16, 4  ;;  %s1190_s19 = sshll.u32 %s1482_s18, 4  ;;  %s1179_s17 = int_to_ptr.vmem [resolvable:$true] %s1178_s17  ;;  %s1191_s19 = int_to_ptr.vmem [resolvable:$true] %s1190_s19 }
 0x224   : > { %1348 = dma.vmem_to_hbm [thread:$0]  (%p2204_p7), %s1179_s17, 16, %s1181_s15, [#allocation6]  }
 0x225   : > { %s1192_s21 = sshll.u32 %s2244_s9, 4  ;;  %s1193_s21 = int_to_ptr.hbm [resolvable:$true] %s1192_s21 }
 0x226   : > { %1350 = dma.vmem_to_hbm [thread:$0]  (%p2204_p7), %s1191_s19, 16, %s1193_s21, [#allocation8]  }
 0x227   : > { %1460 = dma.done.wait (%p2204_p7), [#allocation6], 16  }
 0x228   : > { %1462 = vsyncadd (%p2204_p7), [#allocation6], 4294967280 }
 0x229   : > { %1464 = dma.done.wait (%p2204_p7), [#allocation8], 16  }
 0x22a   : > { %1466 = vsyncadd (%p2204_p7), [#allocation8], 4294967280 }
 0x22b PF: > { %s22_s11 = sadd.s32 1, %s1477_s11   ;;  %s2246_s30 = smov %s1473_s10 }
 0x22c   : > { %p19_p8 = scmp.ge.s32.totalorder %s22_s11, 4   ;;  %s2247_s10 = smov %s2249_s13 }
 0x22e   :  { %21 = sbr.rel (!%p19_p8) target bundleno = 3 (0x3), region = 111 }
 0x233   :  { %1220 = vsyncpa [#allocation6], 1 }
 0x234   :  { %1222 = vsyncpa [#allocation6 + $0x1], 1 }
 0x235   :  { %1223 = vsyncpa [#allocation8], 1 }

</bundles_post_ra>
